<compile_context>
chip_gen: v6e
topology: v6e:2x2x1
jax: 0.10.0
libtpu: 0.0.40
codegen_flags: <defaults>
</compile_context>

<pallas_src>
import functools
import math

import jax
import jax.numpy as jnp
from jax.experimental import pallas as pl
from jax.experimental.pallas import tpu as pltpu

VMEM_LIMIT = 48 * 1024 * 1024  # explicit scoped-VMEM budget (safe on v5e/v6e/v7x)


def _pick_tile(dim, cap):
    """Largest tile <= cap that evenly divides dim (falls back to the full dim)."""
    if dim <= cap:
        return dim
    return cap if dim % cap == 0 else dim


# ----------------------------- Pallas kernels ------------------------------

def _linear_kernel(*refs, activation, fuse_ln, fuse_res):
    """Tiled GEMM with optional LayerNorm prologue, bias, GELU, residual epilogue."""
    x_ref, w_ref, b_ref = refs[0], refs[1], refs[2]
    pos = 3
    if fuse_ln:
        g_ref, gb_ref = refs[pos], refs[pos + 1]
        pos += 2
    if fuse_res:
        r_ref = refs[pos]
        pos += 1
    o_ref, acc_ref = refs[pos], refs[pos + 1]

    k = pl.program_id(2)

    @pl.when(k == 0)
    def _():
        acc_ref[...] = jnp.zeros_like(acc_ref)

    x = x_ref[...]
    if fuse_ln:  # only used when the K axis has a single tile (full feature row)
        xf = x.astype(jnp.float32)
        mean = jnp.mean(xf, axis=-1, keepdims=True)
        var = jnp.mean((xf - mean) ** 2, axis=-1, keepdims=True)
        xf = (xf - mean) * jax.lax.rsqrt(var + 1e-5)
        x = (xf * g_ref[...].astype(jnp.float32)
             + gb_ref[...].astype(jnp.float32)).astype(x_ref.dtype)

    acc_ref[...] += jnp.dot(x, w_ref[...], preferred_element_type=jnp.float32)

    @pl.when(k == pl.num_programs(2) - 1)
    def _():
        y = acc_ref[...] + b_ref[...].astype(jnp.float32)
        if activation == "gelu":  # exact (erf-based) GELU, matching nn.GELU()
            y = 0.5 * y * (1.0 + jax.lax.erf(y * (1.0 / math.sqrt(2.0))))
        if fuse_res:
            y = y + r_ref[...].astype(jnp.float32)
        o_ref[...] = y.astype(o_ref.dtype)


def _layernorm_kernel(x_ref, g_ref, b_ref, o_ref):
    x = x_ref[...].astype(jnp.float32)
    mean = jnp.mean(x, axis=-1, keepdims=True)
    var = jnp.mean((x - mean) ** 2, axis=-1, keepdims=True)
    y = (x - mean) * jax.lax.rsqrt(var + 1e-5)
    o_ref[...] = (y * g_ref[...].astype(jnp.float32)
                  + b_ref[...].astype(jnp.float32)).astype(o_ref.dtype)


def _flash_attn_kernel(q_ref, k_ref, v_ref, bias_ref, o_ref,
                       m_ref, l_ref, acc_ref, *, heads, scale):
    """Flash-style attention; heads folded into the lane dim, per-head 2D matmuls."""
    kv = pl.program_id(2)
    dk = q_ref.shape[2] // heads

    @pl.when(kv == 0)
    def _():
        m_ref[...] = jnp.full_like(m_ref, -jnp.inf)
        l_ref[...] = jnp.zeros_like(l_ref)
        acc_ref[...] = jnp.zeros_like(acc_ref)

    q = q_ref[0]          # (tq, H*dk)   lane-dense block
    k = k_ref[0]          # (tkv, H*dk)
    v = v_ref[0]
    for h in range(heads):
        qh = q[:, h * dk:(h + 1) * dk] * scale
        kh = k[:, h * dk:(h + 1) * dk]
        vh = v[:, h * dk:(h + 1) * dk]
        # scores (tq, tkv): contract the d axis of both operands (no transpose needed)
        s = jax.lax.dot_general(qh, kh, (((1,), (1,)), ((), ())),
                                preferred_element_type=jnp.float32)
        s = s + bias_ref[h].astype(jnp.float32)
        m_prev = m_ref[h]                                              # (tq, 1)
        m_new = jnp.maximum(m_prev, jnp.max(s, axis=-1, keepdims=True))
        alpha = jnp.exp(m_prev - m_new)
        p = jnp.exp(s - m_new)
        l_ref[h] = alpha * l_ref[h] + jnp.sum(p, axis=-1, keepdims=True)
        acc_ref[h] = alpha * acc_ref[h] + jnp.dot(
            p.astype(vh.dtype), vh, preferred_element_type=jnp.float32)
        m_ref[h] = m_new

    @pl.when(kv == pl.num_programs(2) - 1)
    def _():
        outs = [acc_ref[h] * pl.reciprocal(l_ref[h], approx=True)
                for h in range(heads)]
        o_ref[0] = jnp.concatenate(outs, axis=-1).astype(o_ref.dtype)


# ----------------------------- kernel wrappers ------------------------------

def linear(x2d, w, b, *, ln=None, residual=None, activation=None,
           tm_cap=256, tn_cap=512, tk_cap=512):
    N, Din = x2d.shape
    Dout = w.shape[1]
    tm = _pick_tile(N, tm_cap)
    tn = _pick_tile(Dout, tn_cap)
    tk = Din if ln is not None else _pick_tile(Din, tk_cap)  # LN prologue needs full rows
    grid = (N // tm, Dout // tn, Din // tk)

    in_specs = [pl.BlockSpec((tm, tk), lambda i, j, k: (i, k)),
                pl.BlockSpec((tk, tn), lambda i, j, k: (k, j)),
                pl.BlockSpec((1, tn), lambda i, j, k: (0, j))]
    args = [x2d, w, b.reshape(1, Dout)]
    if ln is not None:
        g, gb = ln
        in_specs += [pl.BlockSpec((1, tk), lambda i, j, k: (0, k)),
                     pl.BlockSpec((1, tk), lambda i, j, k: (0, k))]
        args += [g.reshape(1, Din), gb.reshape(1, Din)]
    if residual is not None:
        in_specs.append(pl.BlockSpec((tm, tn), lambda i, j, k: (i, j)))
        args.append(residual)

    kern = functools.partial(_linear_kernel, activation=activation,
                             fuse_ln=ln is not None, fuse_res=residual is not None)
    return pl.pallas_call(
        kern,
        out_shape=jax.ShapeDtypeStruct((N, Dout), x2d.dtype),
        grid=grid,
        in_specs=in_specs,
        out_specs=pl.BlockSpec((tm, tn), lambda i, j, k: (i, j)),
        scratch_shapes=[pltpu.VMEM((tm, tn), jnp.float32)],
        compiler_params=pltpu.CompilerParams(
            dimension_semantics=("parallel", "parallel", "arbitrary"),
            vmem_limit_bytes=VMEM_LIMIT),
    )(*args)


def layernorm(x2d, gamma, beta, tm_cap=512):
    N, D = x2d.shape
    tm = _pick_tile(N, tm_cap)
    return pl.pallas_call(
        _layernorm_kernel,
        out_shape=jax.ShapeDtypeStruct((N, D), x2d.dtype),
        grid=(N // tm,),
        in_specs=[pl.BlockSpec((tm, D), lambda i: (i, 0)),
                  pl.BlockSpec((1, D), lambda i: (0, 0)),
                  pl.BlockSpec((1, D), lambda i: (0, 0))],
        out_specs=pl.BlockSpec((tm, D), lambda i: (i, 0)),
        compiler_params=pltpu.CompilerParams(
            dimension_semantics=("parallel",),
            vmem_limit_bytes=VMEM_LIMIT),
    )(x2d, gamma.reshape(1, D), beta.reshape(1, D))


def flash_attention(q, k, v, bias, heads, scale, tq_cap=128, tkv_cap=128):
    B, Lq, D = q.shape
    Lk = k.shape[1]
    dk = D // heads
    tq = _pick_tile(Lq, tq_cap)
    tkv = _pick_tile(Lk, tkv_cap)
    grid = (B, Lq // tq, Lk // tkv)
    kern = functools.partial(_flash_attn_kernel, heads=heads, scale=scale)
    return pl.pallas_call(
        kern,
        out_shape=jax.ShapeDtypeStruct((B, Lq, D), q.dtype),
        grid=grid,
        in_specs=[pl.BlockSpec((1, tq, D), lambda b, qi, ki: (b, qi, 0)),
                  pl.BlockSpec((1, tkv, D), lambda b, qi, ki: (b, ki, 0)),
                  pl.BlockSpec((1, tkv, D), lambda b, qi, ki: (b, ki, 0)),
                  pl.BlockSpec((heads, tq, tkv), lambda b, qi, ki: (0, qi, ki))],
        out_specs=pl.BlockSpec((1, tq, D), lambda b, qi, ki: (b, qi, 0)),
        scratch_shapes=[pltpu.VMEM((heads, tq, 1), jnp.float32),
                        pltpu.VMEM((heads, tq, 1), jnp.float32),
                        pltpu.VMEM((heads, tq, dk), jnp.float32)],
        compiler_params=pltpu.CompilerParams(
            dimension_semantics=("parallel", "parallel", "arbitrary"),
            vmem_limit_bytes=VMEM_LIMIT),
    )(q, k, v, bias)


# ------------------------- model forward (JAX glue) --------------------------

def _rel_bias(rel_table, q_len, k_len, max_len):
    """Clipped-distance relative position bias, shaped (heads, q_len, k_len)."""
    rq = jnp.arange(q_len)[:, None]
    rk = jnp.arange(k_len)[None, :]
    dist = jnp.clip(rq - rk + (max_len - 1), 0, 2 * max_len - 2)
    return jnp.transpose(rel_table[dist], (2, 0, 1)).astype(jnp.float32)


def layer_forward(x, p, heads, max_len):
    L, B, D = x.shape
    flat_x = x.reshape(L * B, D)

    # --- attention block (mem = c_mem = None); norm1 fused into the QKV GEMM ---
    qkv = linear(flat_x, p["W_qkv"], p["b_qkv"], ln=(p["norm1_g"], p["norm1_b"]))
    qkv_b = jnp.transpose(qkv.reshape(L, B, 3 * D), (1, 0, 2))       # (B, L, 3D)
    q, k, v = qkv_b[..., :D], qkv_b[..., D:2 * D], qkv_b[..., 2 * D:]
    bias = _rel_bias(p["rel_table"], L, L, max_len)                  # (H, L, L)
    attn = flash_attention(q, k, v, bias, heads, 1.0 / math.sqrt(D // heads))
    attn_flat = jnp.transpose(attn, (1, 0, 2)).reshape(L * B, D)
    x1 = linear(attn_flat, p["Wo"], p["bo"], residual=flat_x)        # x + attn (dropout=id)

    # --- feed-forward block; norm2 fused into W1, residual fused into W2 ---
    h = linear(x1, p["W1"], p["b1"], ln=(p["norm2_g"], p["norm2_b"]),
               activation="gelu")
    x2 = linear(h, p["W2"], p["b2"], residual=x1)                    # x + ff (dropout=id)
    return x2.reshape(L, B, D)


def compressive_transformer_forward(x, params, heads, max_len):
    new_mems = []
    for p in params["layers"]:
        new_mems.append(x)                # mirrors new_mems.append(x.detach())
        x = layer_forward(x, p, heads, max_len)
    L, B, D = x.shape
    out = layernorm(x.reshape(L * B, D), params["norm_g"], params["norm_b"])
    return out.reshape(L, B, D), new_mems


# ------------------------------ parameter init -------------------------------

def init_params(key, n_layers, d_model, heads, max_len, d_ff=2048):
    def dense(k, din, dout):
        return (0.02 * jax.random.normal(k, (din, dout), jnp.float32),
                jnp.zeros((dout,), jnp.float32))

    layers = []
    keys = jax.random.split(key, n_layers)
    for lk in keys:
        ks = jax.random.split(lk, 5)
        W_qkv, b_qkv = dense(ks[0], d_model, 3 * d_model)   # fused Q|K|V projection
        Wo, bo = dense(ks[1], d_model, d_model)
        rel_table = jax.random.normal(ks[2], (2 * max_len - 1, heads), jnp.float32)
        W1, b1 = dense(ks[3], d_model, d_ff)
        W2, b2 = dense(ks[4], d_ff, d_model)
        layers.append(dict(
            W_qkv=W_qkv, b_qkv=b_qkv, Wo=Wo, bo=bo, rel_table=rel_table,
            W1=W1, b1=b1, W2=W2, b2=b2,
            norm1_g=jnp.ones((d_model,), jnp.float32),
            norm1_b=jnp.zeros((d_model,), jnp.float32),
            norm2_g=jnp.ones((d_model,), jnp.float32),
            norm2_b=jnp.zeros((d_model,), jnp.float32)))
    return dict(layers=layers,
                norm_g=jnp.ones((d_model,), jnp.float32),
                norm_b=jnp.zeros((d_model,), jnp.float32))


# ---------------------------------- main --------------------------------------

if __name__ == "__main__":
    n_layers, d_model, heads, max_len = 2, 32, 4, 16
    seq_len, batch = 8, 2

    root = jax.random.PRNGKey(0)
    kx, kp = jax.random.split(root)
    x = jax.random.normal(kx, (seq_len, batch, d_model), jnp.float32)
    params = init_params(kp, n_layers, d_model, heads, max_len)

    fwd = jax.jit(functools.partial(compressive_transformer_forward,
                                    heads=heads, max_len=max_len))
    out, new_mems = fwd(x, params)
    jax.block_until_ready(out)
    for m in new_mems:
        jax.block_until_ready(m)

    assert out.shape == (seq_len, batch, d_model)
    assert len(new_mems) == n_layers
    print("KERNEL_OK")
</pallas_src>

<mosaic_0001>
module attributes {stable_mosaic.version = 11 : i64} {
  func.func @_linear_kernel(%arg0: i32, %arg1: i32, %arg2: i32, %arg3: memref<16x32xf32, #tpu.memory_space<vmem>>, %arg4: memref<32x96xf32, #tpu.memory_space<vmem>>, %arg5: memref<1x96xf32, #tpu.memory_space<vmem>>, %arg6: memref<1x32xf32, #tpu.memory_space<vmem>>, %arg7: memref<1x32xf32, #tpu.memory_space<vmem>>, %arg8: memref<16x96xf32, #tpu.memory_space<vmem>>, %arg9: memref<16x96xf32, #tpu.memory_space<vmem>>) attributes {dimension_semantics = [#tpu.dimension_semantics<parallel>, #tpu.dimension_semantics<parallel>, #tpu.dimension_semantics<arbitrary>], iteration_bounds = array<i64: 1, 1, 1>, scalar_prefetch = 0 : i64, scratch_operands = 1 : i64, tpu.core_type = #tpu.core_type<tc>, window_params = [{transform_indices = @transform_0, window_bounds = array<i64: 16, 32>}, {transform_indices = @transform_1, window_bounds = array<i64: 32, 96>}, {transform_indices = @transform_2, window_bounds = array<i64: 1, 96>}, {transform_indices = @transform_3, window_bounds = array<i64: 1, 32>}, {transform_indices = @transform_4, window_bounds = array<i64: 1, 32>}, {transform_indices = @transform_5, window_bounds = array<i64: 16, 96>}]} {
    %c0_i32 = arith.constant 0 : i32
    %0 = arith.cmpi eq, %arg2, %c0_i32 : i32
    %1 = arith.extui %0 : i1 to i32
    %c0_i32_0 = arith.constant 0 : i32
    %2 = arith.cmpi ne, %1, %c0_i32_0 : i32
    scf.if %2 {
      %cst_19 = arith.constant 0.000000e+00 : f32
      %36 = vector.broadcast %cst_19 : f32 to vector<16x96xf32>
      %c0_20 = arith.constant 0 : index
      %c0_21 = arith.constant 0 : index
      %37 = vector.load %arg9[%c0_20, %c0_21] : memref<16x96xf32, #tpu.memory_space<vmem>>, vector<16x96xf32>
      tpu.vector_store %arg9[%c0_20, %c0_21], %36 {strides = array<i32>} : memref<16x96xf32, #tpu.memory_space<vmem>>, vector<16x96xf32>,
    } else {
    }
    %c0 = arith.constant 0 : index
    %c0_1 = arith.constant 0 : index
    %3 = vector.load %arg3[%c0, %c0_1] : memref<16x32xf32, #tpu.memory_space<vmem>>, vector<16x32xf32>
    %cst = arith.constant dense<0.000000e+00> : vector<16xf32>
    %4 = vector.multi_reduction <add>, %3, %cst [1] : vector<16x32xf32> to vector<16xf32>
    %5 = vector.shape_cast %4 : vector<16xf32> to vector<16x1xf32>
    %cst_2 = arith.constant 3.200000e+01 : f32
    %6 = vector.broadcast %cst_2 : f32 to vector<16x1xf32>
    %7 = arith.divf %5, %6 : vector<16x1xf32>
    %8 = vector.broadcast %7 : vector<16x1xf32> to vector<16x32xf32>
    %9 = arith.subf %3, %8 : vector<16x32xf32>
    %10 = arith.mulf %9, %9 : vector<16x32xf32>
    %cst_3 = arith.constant dense<0.000000e+00> : vector<16xf32>
    %11 = vector.multi_reduction <add>, %10, %cst_3 [1] : vector<16x32xf32> to vector<16xf32>
    %12 = vector.shape_cast %11 : vector<16xf32> to vector<16x1xf32>
    %cst_4 = arith.constant 3.200000e+01 : f32
    %13 = vector.broadcast %cst_4 : f32 to vector<16x1xf32>
    %14 = arith.divf %12, %13 : vector<16x1xf32>
    %15 = vector.broadcast %7 : vector<16x1xf32> to vector<16x32xf32>
    %16 = arith.subf %3, %15 : vector<16x32xf32>
    %cst_5 = arith.constant 9.99999974E-6 : f32
    %17 = vector.broadcast %cst_5 : f32 to vector<16x1xf32>
    %18 = arith.addf %14, %17 : vector<16x1xf32>
    %19 = math.rsqrt %18 : vector<16x1xf32>
    %20 = vector.broadcast %19 : vector<16x1xf32> to vector<16x32xf32>
    %21 = arith.mulf %16, %20 : vector<16x32xf32>
    %c0_6 = arith.constant 0 : index
    %c0_7 = arith.constant 0 : index
    %22 = vector.load %arg6[%c0_6, %c0_7] : memref<1x32xf32, #tpu.memory_space<vmem>>, vector<1x32xf32>
    %23 = vector.broadcast %22 : vector<1x32xf32> to vector<16x32xf32>
    %24 = arith.mulf %21, %23 : vector<16x32xf32>
    %c0_8 = arith.constant 0 : index
    %c0_9 = arith.constant 0 : index
    %25 = vector.load %arg7[%c0_8, %c0_9] : memref<1x32xf32, #tpu.memory_space<vmem>>, vector<1x32xf32>
    %26 = vector.broadcast %25 : vector<1x32xf32> to vector<16x32xf32>
    %27 = arith.addf %24, %26 : vector<16x32xf32>
    %c0_10 = arith.constant 0 : index
    %c0_11 = arith.constant 0 : index
    %28 = vector.load %arg9[%c0_10, %c0_11] : memref<16x96xf32, #tpu.memory_space<vmem>>, vector<16x96xf32>
    %c0_12 = arith.constant 0 : index
    %c0_13 = arith.constant 0 : index
    %29 = vector.load %arg4[%c0_12, %c0_13] : memref<32x96xf32, #tpu.memory_space<vmem>>, vector<32x96xf32>
    %cst_14 = arith.constant dense<0.000000e+00> : vector<16x96xf32>
    %30 = tpu.matmul %27, %29, %cst_14 {dimension_numbers = #tpu.dot_dimension_numbers<[1], [0], [0], [1], [0, 0, 1, 1], [], []>} : vector<16x32xf32>, vector<32x96xf32>, vector<16x96xf32> -> vector<16x96xf32>
    %31 = arith.addf %28, %30 : vector<16x96xf32>
    %c0_15 = arith.constant 0 : index
    %c0_16 = arith.constant 0 : index
    %32 = vector.load %arg9[%c0_15, %c0_16] : memref<16x96xf32, #tpu.memory_space<vmem>>, vector<16x96xf32>
    tpu.vector_store %arg9[%c0_15, %c0_16], %31 {strides = array<i32>} : memref<16x96xf32, #tpu.memory_space<vmem>>, vector<16x96xf32>,
    %c0_i32_17 = arith.constant 0 : i32
    %33 = arith.cmpi eq, %arg2, %c0_i32_17 : i32
    %34 = arith.extui %33 : i1 to i32
    %c0_i32_18 = arith.constant 0 : i32
    %35 = arith.cmpi ne, %34, %c0_i32_18 : i32
    scf.if %35 {
      %c0_19 = arith.constant 0 : index
      %c0_20 = arith.constant 0 : index
      %36 = vector.load %arg9[%c0_19, %c0_20] : memref<16x96xf32, #tpu.memory_space<vmem>>, vector<16x96xf32>
      %c0_21 = arith.constant 0 : index
      %c0_22 = arith.constant 0 : index
      %37 = vector.load %arg5[%c0_21, %c0_22] : memref<1x96xf32, #tpu.memory_space<vmem>>, vector<1x96xf32>
      %38 = vector.broadcast %37 : vector<1x96xf32> to vector<16x96xf32>
      %39 = arith.addf %36, %38 : vector<16x96xf32>
      %c0_23 = arith.constant 0 : index
      %c0_24 = arith.constant 0 : index
      %40 = vector.load %arg8[%c0_23, %c0_24] : memref<16x96xf32, #tpu.memory_space<vmem>>, vector<16x96xf32>
      tpu.vector_store %arg8[%c0_23, %c0_24], %39 {strides = array<i32>} : memref<16x96xf32, #tpu.memory_space<vmem>>, vector<16x96xf32>,
    } else {
    }
    return
  }
  func.func @transform_0(%arg0: i32, %arg1: i32, %arg2: i32) -> (i32, i32) {
    %c0_i32 = arith.constant 0 : i32
    return %arg0, %arg2 : i32, i32
  }
  func.func @transform_1(%arg0: i32, %arg1: i32, %arg2: i32) -> (i32, i32) {
    %c0_i32 = arith.constant 0 : i32
    return %arg2, %arg1 : i32, i32
  }
  func.func @transform_2(%arg0: i32, %arg1: i32, %arg2: i32) -> (i32, i32) {
    %c0_i32 = arith.constant 0 : i32
    %c0_i32_0 = arith.constant 0 : i32
    return %c0_i32, %arg1 : i32, i32
  }
  func.func @transform_3(%arg0: i32, %arg1: i32, %arg2: i32) -> (i32, i32) {
    %c0_i32 = arith.constant 0 : i32
    %c0_i32_0 = arith.constant 0 : i32
    return %c0_i32, %arg2 : i32, i32
  }
  func.func @transform_4(%arg0: i32, %arg1: i32, %arg2: i32) -> (i32, i32) {
    %c0_i32 = arith.constant 0 : i32
    %c0_i32_0 = arith.constant 0 : i32
    return %c0_i32, %arg2 : i32, i32
  }
  func.func @transform_5(%arg0: i32, %arg1: i32, %arg2: i32) -> (i32, i32) {
    %c0_i32 = arith.constant 0 : i32
    return %arg0, %arg1 : i32, i32
  }
}

module attributes {stable_mosaic.version = 11 : i64} {
  func.func @_linear_kernel(%arg0: i32, %arg1: i32, %arg2: i32, %arg3: memref<16x32xf32, #tpu.memory_space<vmem>>, %arg4: memref<32x32xf32, #tpu.memory_space<vmem>>, %arg5: memref<1x32xf32, #tpu.memory_space<vmem>>, %arg6: memref<16x32xf32, #tpu.memory_space<vmem>>, %arg7: memref<16x32xf32, #tpu.memory_space<vmem>>, %arg8: memref<16x32xf32, #tpu.memory_space<vmem>>) attributes {dimension_semantics = [#tpu.dimension_semantics<parallel>, #tpu.dimension_semantics<parallel>, #tpu.dimension_semantics<arbitrary>], iteration_bounds = array<i64: 1, 1, 1>, scalar_prefetch = 0 : i64, scratch_operands = 1 : i64, tpu.core_type = #tpu.core_type<tc>, window_params = [{transform_indices = @transform_0, window_bounds = array<i64: 16, 32>}, {transform_indices = @transform_1, window_bounds = array<i64: 32, 32>}, {transform_indices = @transform_2, window_bounds = array<i64: 1, 32>}, {transform_indices = @transform_3, window_bounds = array<i64: 16, 32>}, {transform_indices = @transform_4, window_bounds = array<i64: 16, 32>}]} {
    %c0_i32 = arith.constant 0 : i32
    %0 = arith.cmpi eq, %arg2, %c0_i32 : i32
    %1 = arith.extui %0 : i1 to i32
    %c0_i32_0 = arith.constant 0 : i32
    %2 = arith.cmpi ne, %1, %c0_i32_0 : i32
    scf.if %2 {
      %cst_10 = arith.constant 0.000000e+00 : f32
      %12 = vector.broadcast %cst_10 : f32 to vector<16x32xf32>
      %c0_11 = arith.constant 0 : index
      %c0_12 = arith.constant 0 : index
      %13 = vector.load %arg8[%c0_11, %c0_12] : memref<16x32xf32, #tpu.memory_space<vmem>>, vector<16x32xf32>
      tpu.vector_store %arg8[%c0_11, %c0_12], %12 {strides = array<i32>} : memref<16x32xf32, #tpu.memory_space<vmem>>, vector<16x32xf32>,
    } else {
    }
    %c0 = arith.constant 0 : index
    %c0_1 = arith.constant 0 : index
    %3 = vector.load %arg3[%c0, %c0_1] : memref<16x32xf32, #tpu.memory_space<vmem>>, vector<16x32xf32>
    %c0_2 = arith.constant 0 : index
    %c0_3 = arith.constant 0 : index
    %4 = vector.load %arg8[%c0_2, %c0_3] : memref<16x32xf32, #tpu.memory_space<vmem>>, vector<16x32xf32>
    %c0_4 = arith.constant 0 : index
    %c0_5 = arith.constant 0 : index
    %5 = vector.load %arg4[%c0_4, %c0_5] : memref<32x32xf32, #tpu.memory_space<vmem>>, vector<32x32xf32>
    %cst = arith.constant dense<0.000000e+00> : vector<16x32xf32>
    %6 = tpu.matmul %3, %5, %cst {dimension_numbers = #tpu.dot_dimension_numbers<[1], [0], [0], [1], [0, 0, 1, 1], [], []>} : vector<16x32xf32>, vector<32x32xf32>, vector<16x32xf32> -> vector<16x32xf32>
    %7 = arith.addf %4, %6 : vector<16x32xf32>
    %c0_6 = arith.constant 0 : index
    %c0_7 = arith.constant 0 : index
    %8 = vector.load %arg8[%c0_6, %c0_7] : memref<16x32xf32, #tpu.memory_space<vmem>>, vector<16x32xf32>
    tpu.vector_store %arg8[%c0_6, %c0_7], %7 {strides = array<i32>} : memref<16x32xf32, #tpu.memory_space<vmem>>, vector<16x32xf32>,
    %c0_i32_8 = arith.constant 0 : i32
    %9 = arith.cmpi eq, %arg2, %c0_i32_8 : i32
    %10 = arith.extui %9 : i1 to i32
    %c0_i32_9 = arith.constant 0 : i32
    %11 = arith.cmpi ne, %10, %c0_i32_9 : i32
    scf.if %11 {
      %c0_10 = arith.constant 0 : index
      %c0_11 = arith.constant 0 : index
      %12 = vector.load %arg8[%c0_10, %c0_11] : memref<16x32xf32, #tpu.memory_space<vmem>>, vector<16x32xf32>
      %c0_12 = arith.constant 0 : index
      %c0_13 = arith.constant 0 : index
      %13 = vector.load %arg5[%c0_12, %c0_13] : memref<1x32xf32, #tpu.memory_space<vmem>>, vector<1x32xf32>
      %14 = vector.broadcast %13 : vector<1x32xf32> to vector<16x32xf32>
      %15 = arith.addf %12, %14 : vector<16x32xf32>
      %c0_14 = arith.constant 0 : index
      %c0_15 = arith.constant 0 : index
      %16 = vector.load %arg6[%c0_14, %c0_15] : memref<16x32xf32, #tpu.memory_space<vmem>>, vector<16x32xf32>
      %17 = arith.addf %15, %16 : vector<16x32xf32>
      %c0_16 = arith.constant 0 : index
      %c0_17 = arith.constant 0 : index
      %18 = vector.load %arg7[%c0_16, %c0_17] : memref<16x32xf32, #tpu.memory_space<vmem>>, vector<16x32xf32>
      tpu.vector_store %arg7[%c0_16, %c0_17], %17 {strides = array<i32>} : memref<16x32xf32, #tpu.memory_space<vmem>>, vector<16x32xf32>,
    } else {
    }
    return
  }
  func.func @transform_0(%arg0: i32, %arg1: i32, %arg2: i32) -> (i32, i32) {
    %c0_i32 = arith.constant 0 : i32
    return %arg0, %arg2 : i32, i32
  }
  func.func @transform_1(%arg0: i32, %arg1: i32, %arg2: i32) -> (i32, i32) {
    %c0_i32 = arith.constant 0 : i32
    return %arg2, %arg1 : i32, i32
  }
  func.func @transform_2(%arg0: i32, %arg1: i32, %arg2: i32) -> (i32, i32) {
    %c0_i32 = arith.constant 0 : i32
    %c0_i32_0 = arith.constant 0 : i32
    return %c0_i32, %arg1 : i32, i32
  }
  func.func @transform_3(%arg0: i32, %arg1: i32, %arg2: i32) -> (i32, i32) {
    %c0_i32 = arith.constant 0 : i32
    return %arg0, %arg1 : i32, i32
  }
  func.func @transform_4(%arg0: i32, %arg1: i32, %arg2: i32) -> (i32, i32) {
    %c0_i32 = arith.constant 0 : i32
    return %arg0, %arg1 : i32, i32
  }
}

module attributes {stable_mosaic.version = 11 : i64} {
  func.func @_linear_kernel(%arg0: i32, %arg1: i32, %arg2: i32, %arg3: memref<16x32xf32, #tpu.memory_space<vmem>>, %arg4: memref<32x512xf32, #tpu.memory_space<vmem>>, %arg5: memref<1x512xf32, #tpu.memory_space<vmem>>, %arg6: memref<1x32xf32, #tpu.memory_space<vmem>>, %arg7: memref<1x32xf32, #tpu.memory_space<vmem>>, %arg8: memref<16x512xf32, #tpu.memory_space<vmem>>, %arg9: memref<16x512xf32, #tpu.memory_space<vmem>>) attributes {dimension_semantics = [#tpu.dimension_semantics<parallel>, #tpu.dimension_semantics<parallel>, #tpu.dimension_semantics<arbitrary>], iteration_bounds = array<i64: 1, 4, 1>, scalar_prefetch = 0 : i64, scratch_operands = 1 : i64, tpu.core_type = #tpu.core_type<tc>, window_params = [{transform_indices = @transform_0, window_bounds = array<i64: 16, 32>}, {transform_indices = @transform_1, window_bounds = array<i64: 32, 512>}, {transform_indices = @transform_2, window_bounds = array<i64: 1, 512>}, {transform_indices = @transform_3, window_bounds = array<i64: 1, 32>}, {transform_indices = @transform_4, window_bounds = array<i64: 1, 32>}, {transform_indices = @transform_5, window_bounds = array<i64: 16, 512>}]} {
    %c0_i32 = arith.constant 0 : i32
    %0 = arith.cmpi eq, %arg2, %c0_i32 : i32
    %1 = arith.extui %0 : i1 to i32
    %c0_i32_0 = arith.constant 0 : i32
    %2 = arith.cmpi ne, %1, %c0_i32_0 : i32
    scf.if %2 {
      %cst_19 = arith.constant 0.000000e+00 : f32
      %36 = vector.broadcast %cst_19 : f32 to vector<16x512xf32>
      %c0_20 = arith.constant 0 : index
      %c0_21 = arith.constant 0 : index
      %37 = vector.load %arg9[%c0_20, %c0_21] : memref<16x512xf32, #tpu.memory_space<vmem>>, vector<16x512xf32>
      tpu.vector_store %arg9[%c0_20, %c0_21], %36 {strides = array<i32>} : memref<16x512xf32, #tpu.memory_space<vmem>>, vector<16x512xf32>,
    } else {
    }
    %c0 = arith.constant 0 : index
    %c0_1 = arith.constant 0 : index
    %3 = vector.load %arg3[%c0, %c0_1] : memref<16x32xf32, #tpu.memory_space<vmem>>, vector<16x32xf32>
    %cst = arith.constant dense<0.000000e+00> : vector<16xf32>
    %4 = vector.multi_reduction <add>, %3, %cst [1] : vector<16x32xf32> to vector<16xf32>
    %5 = vector.shape_cast %4 : vector<16xf32> to vector<16x1xf32>
    %cst_2 = arith.constant 3.200000e+01 : f32
    %6 = vector.broadcast %cst_2 : f32 to vector<16x1xf32>
    %7 = arith.divf %5, %6 : vector<16x1xf32>
    %8 = vector.broadcast %7 : vector<16x1xf32> to vector<16x32xf32>
    %9 = arith.subf %3, %8 : vector<16x32xf32>
    %10 = arith.mulf %9, %9 : vector<16x32xf32>
    %cst_3 = arith.constant dense<0.000000e+00> : vector<16xf32>
    %11 = vector.multi_reduction <add>, %10, %cst_3 [1] : vector<16x32xf32> to vector<16xf32>
    %12 = vector.shape_cast %11 : vector<16xf32> to vector<16x1xf32>
    %cst_4 = arith.constant 3.200000e+01 : f32
    %13 = vector.broadcast %cst_4 : f32 to vector<16x1xf32>
    %14 = arith.divf %12, %13 : vector<16x1xf32>
    %15 = vector.broadcast %7 : vector<16x1xf32> to vector<16x32xf32>
    %16 = arith.subf %3, %15 : vector<16x32xf32>
    %cst_5 = arith.constant 9.99999974E-6 : f32
    %17 = vector.broadcast %cst_5 : f32 to vector<16x1xf32>
    %18 = arith.addf %14, %17 : vector<16x1xf32>
    %19 = math.rsqrt %18 : vector<16x1xf32>
    %20 = vector.broadcast %19 : vector<16x1xf32> to vector<16x32xf32>
    %21 = arith.mulf %16, %20 : vector<16x32xf32>
    %c0_6 = arith.constant 0 : index
    %c0_7 = arith.constant 0 : index
    %22 = vector.load %arg6[%c0_6, %c0_7] : memref<1x32xf32, #tpu.memory_space<vmem>>, vector<1x32xf32>
    %23 = vector.broadcast %22 : vector<1x32xf32> to vector<16x32xf32>
    %24 = arith.mulf %21, %23 : vector<16x32xf32>
    %c0_8 = arith.constant 0 : index
    %c0_9 = arith.constant 0 : index
    %25 = vector.load %arg7[%c0_8, %c0_9] : memref<1x32xf32, #tpu.memory_space<vmem>>, vector<1x32xf32>
    %26 = vector.broadcast %25 : vector<1x32xf32> to vector<16x32xf32>
    %27 = arith.addf %24, %26 : vector<16x32xf32>
    %c0_10 = arith.constant 0 : index
    %c0_11 = arith.constant 0 : index
    %28 = vector.load %arg9[%c0_10, %c0_11] : memref<16x512xf32, #tpu.memory_space<vmem>>, vector<16x512xf32>
    %c0_12 = arith.constant 0 : index
    %c0_13 = arith.constant 0 : index
    %29 = vector.load %arg4[%c0_12, %c0_13] : memref<32x512xf32, #tpu.memory_space<vmem>>, vector<32x512xf32>
    %cst_14 = arith.constant dense<0.000000e+00> : vector<16x512xf32>
    %30 = tpu.matmul %27, %29, %cst_14 {dimension_numbers = #tpu.dot_dimension_numbers<[1], [0], [0], [1], [0, 0, 1, 1], [], []>} : vector<16x32xf32>, vector<32x512xf32>, vector<16x512xf32> -> vector<16x512xf32>
    %31 = arith.addf %28, %30 : vector<16x512xf32>
    %c0_15 = arith.constant 0 : index
    %c0_16 = arith.constant 0 : index
    %32 = vector.load %arg9[%c0_15, %c0_16] : memref<16x512xf32, #tpu.memory_space<vmem>>, vector<16x512xf32>
    tpu.vector_store %arg9[%c0_15, %c0_16], %31 {strides = array<i32>} : memref<16x512xf32, #tpu.memory_space<vmem>>, vector<16x512xf32>,
    %c0_i32_17 = arith.constant 0 : i32
    %33 = arith.cmpi eq, %arg2, %c0_i32_17 : i32
    %34 = arith.extui %33 : i1 to i32
    %c0_i32_18 = arith.constant 0 : i32
    %35 = arith.cmpi ne, %34, %c0_i32_18 : i32
    scf.if %35 {
      %c0_19 = arith.constant 0 : index
      %c0_20 = arith.constant 0 : index
      %36 = vector.load %arg9[%c0_19, %c0_20] : memref<16x512xf32, #tpu.memory_space<vmem>>, vector<16x512xf32>
      %c0_21 = arith.constant 0 : index
      %c0_22 = arith.constant 0 : index
      %37 = vector.load %arg5[%c0_21, %c0_22] : memref<1x512xf32, #tpu.memory_space<vmem>>, vector<1x512xf32>
      %38 = vector.broadcast %37 : vector<1x512xf32> to vector<16x512xf32>
      %39 = arith.addf %36, %38 : vector<16x512xf32>
      %cst_23 = arith.constant 5.000000e-01 : f32
      %40 = vector.broadcast %cst_23 : f32 to vector<16x512xf32>
      %41 = arith.mulf %40, %39 : vector<16x512xf32>
      %cst_24 = arith.constant 0.707106769 : f32
      %42 = vector.broadcast %cst_24 : f32 to vector<16x512xf32>
      %43 = arith.mulf %39, %42 : vector<16x512xf32>
      %44 = math.erf %43 : vector<16x512xf32>
      %cst_25 = arith.constant 1.000000e+00 : f32
      %45 = vector.broadcast %cst_25 : f32 to vector<16x512xf32>
      %46 = arith.addf %45, %44 : vector<16x512xf32>
      %47 = arith.mulf %41, %46 : vector<16x512xf32>
      %c0_26 = arith.constant 0 : index
      %c0_27 = arith.constant 0 : index
      %48 = vector.load %arg8[%c0_26, %c0_27] : memref<16x512xf32, #tpu.memory_space<vmem>>, vector<16x512xf32>
      tpu.vector_store %arg8[%c0_26, %c0_27], %47 {strides = array<i32>} : memref<16x512xf32, #tpu.memory_space<vmem>>, vector<16x512xf32>,
    } else {
    }
    return
  }
  func.func @transform_0(%arg0: i32, %arg1: i32, %arg2: i32) -> (i32, i32) {
    %c0_i32 = arith.constant 0 : i32
    return %arg0, %arg2 : i32, i32
  }
  func.func @transform_1(%arg0: i32, %arg1: i32, %arg2: i32) -> (i32, i32) {
    %c0_i32 = arith.constant 0 : i32
    return %arg2, %arg1 : i32, i32
  }
  func.func @transform_2(%arg0: i32, %arg1: i32, %arg2: i32) -> (i32, i32) {
    %c0_i32 = arith.constant 0 : i32
    %c0_i32_0 = arith.constant 0 : i32
    return %c0_i32, %arg1 : i32, i32
  }
  func.func @transform_3(%arg0: i32, %arg1: i32, %arg2: i32) -> (i32, i32) {
    %c0_i32 = arith.constant 0 : i32
    %c0_i32_0 = arith.constant 0 : i32
    return %c0_i32, %arg2 : i32, i32
  }
  func.func @transform_4(%arg0: i32, %arg1: i32, %arg2: i32) -> (i32, i32) {
    %c0_i32 = arith.constant 0 : i32
    %c0_i32_0 = arith.constant 0 : i32
    return %c0_i32, %arg2 : i32, i32
  }
  func.func @transform_5(%arg0: i32, %arg1: i32, %arg2: i32) -> (i32, i32) {
    %c0_i32 = arith.constant 0 : i32
    return %arg0, %arg1 : i32, i32
  }
}

module attributes {stable_mosaic.version = 11 : i64} {
  func.func @_flash_attn_kernel(%arg0: i32, %arg1: i32, %arg2: i32, %arg3: memref<1x8x32xf32, #tpu.memory_space<vmem>>, %arg4: memref<1x8x32xf32, #tpu.memory_space<vmem>>, %arg5: memref<1x8x32xf32, #tpu.memory_space<vmem>>, %arg6: memref<4x8x8xf32, #tpu.memory_space<vmem>>, %arg7: memref<1x8x32xf32, #tpu.memory_space<vmem>>, %arg8: memref<4x8x1xf32, #tpu.memory_space<vmem>>, %arg9: memref<4x8x1xf32, #tpu.memory_space<vmem>>, %arg10: memref<4x8x8xf32, #tpu.memory_space<vmem>>) attributes {dimension_semantics = [#tpu.dimension_semantics<parallel>, #tpu.dimension_semantics<parallel>, #tpu.dimension_semantics<arbitrary>], iteration_bounds = array<i64: 2, 1, 1>, scalar_prefetch = 0 : i64, scratch_operands = 3 : i64, tpu.core_type = #tpu.core_type<tc>, window_params = [{transform_indices = @transform_0, window_bounds = array<i64: 1, 8, 32>}, {transform_indices = @transform_1, window_bounds = array<i64: 1, 8, 32>}, {transform_indices = @transform_2, window_bounds = array<i64: 1, 8, 32>}, {transform_indices = @transform_3, window_bounds = array<i64: 4, 8, 8>}, {transform_indices = @transform_4, window_bounds = array<i64: 1, 8, 32>}]} {
    %c0_i32 = arith.constant 0 : i32
    %0 = arith.cmpi eq, %arg2, %c0_i32 : i32
    %1 = arith.extui %0 : i1 to i32
    %c0_i32_0 = arith.constant 0 : i32
    %2 = arith.cmpi ne, %1, %c0_i32_0 : i32
    scf.if %2 {
      %cst_111 = arith.constant 0xFF800000 : f32
      %172 = vector.broadcast %cst_111 : f32 to vector<4x8x1xf32>
      %c0_112 = arith.constant 0 : index
      %c0_113 = arith.constant 0 : index
      %c0_114 = arith.constant 0 : index
      %173 = vector.load %arg8[%c0_112, %c0_113, %c0_114] : memref<4x8x1xf32, #tpu.memory_space<vmem>>, vector<4x8x1xf32>
      tpu.vector_store %arg8[%c0_112, %c0_113, %c0_114], %172 {strides = array<i32>} : memref<4x8x1xf32, #tpu.memory_space<vmem>>, vector<4x8x1xf32>,
      %cst_115 = arith.constant 0.000000e+00 : f32
      %174 = vector.broadcast %cst_115 : f32 to vector<4x8x1xf32>
      %c0_116 = arith.constant 0 : index
      %c0_117 = arith.constant 0 : index
      %c0_118 = arith.constant 0 : index
      %175 = vector.load %arg9[%c0_116, %c0_117, %c0_118] : memref<4x8x1xf32, #tpu.memory_space<vmem>>, vector<4x8x1xf32>
      tpu.vector_store %arg9[%c0_116, %c0_117, %c0_118], %174 {strides = array<i32>} : memref<4x8x1xf32, #tpu.memory_space<vmem>>, vector<4x8x1xf32>,
      %cst_119 = arith.constant 0.000000e+00 : f32
      %176 = vector.broadcast %cst_119 : f32 to vector<4x8x8xf32>
      %c0_120 = arith.constant 0 : index
      %c0_121 = arith.constant 0 : index
      %c0_122 = arith.constant 0 : index
      %177 = vector.load %arg10[%c0_120, %c0_121, %c0_122] : memref<4x8x8xf32, #tpu.memory_space<vmem>>, vector<4x8x8xf32>
      tpu.vector_store %arg10[%c0_120, %c0_121, %c0_122], %176 {strides = array<i32>} : memref<4x8x8xf32, #tpu.memory_space<vmem>>, vector<4x8x8xf32>,
    } else {
    }
    %c0 = arith.constant 0 : index
    %c0_1 = arith.constant 0 : index
    %c0_2 = arith.constant 0 : index
    %3 = vector.load %arg3[%c0, %c0_1, %c0_2] : memref<1x8x32xf32, #tpu.memory_space<vmem>>, vector<1x8x32xf32>
    %4 = vector.shape_cast %3 : vector<1x8x32xf32> to vector<8x32xf32>
    %c0_3 = arith.constant 0 : index
    %c0_4 = arith.constant 0 : index
    %c0_5 = arith.constant 0 : index
    %5 = vector.load %arg4[%c0_3, %c0_4, %c0_5] : memref<1x8x32xf32, #tpu.memory_space<vmem>>, vector<1x8x32xf32>
    %6 = vector.shape_cast %5 : vector<1x8x32xf32> to vector<8x32xf32>
    %c0_6 = arith.constant 0 : index
    %c0_7 = arith.constant 0 : index
    %c0_8 = arith.constant 0 : index
    %7 = vector.load %arg5[%c0_6, %c0_7, %c0_8] : memref<1x8x32xf32, #tpu.memory_space<vmem>>, vector<1x8x32xf32>
    %8 = vector.shape_cast %7 : vector<1x8x32xf32> to vector<8x32xf32>
    %9 = vector.extract_strided_slice %4 {offsets = [0, 0], sizes = [8, 8], strides = [1, 1]} : vector<8x32xf32> to vector<8x8xf32>
    %cst = arith.constant 0.353553385 : f32
    %10 = vector.broadcast %cst : f32 to vector<8x8xf32>
    %11 = arith.mulf %9, %10 : vector<8x8xf32>
    %12 = vector.extract_strided_slice %6 {offsets = [0, 0], sizes = [8, 8], strides = [1, 1]} : vector<8x32xf32> to vector<8x8xf32>
    %13 = vector.extract_strided_slice %8 {offsets = [0, 0], sizes = [8, 8], strides = [1, 1]} : vector<8x32xf32> to vector<8x8xf32>
    %cst_9 = arith.constant dense<0.000000e+00> : vector<8x8xf32>
    %14 = tpu.matmul %11, %12, %cst_9 {dimension_numbers = #tpu.dot_dimension_numbers<[1], [1], [0], [0], [0, 0, 1, 0], [], []>} : vector<8x8xf32>, vector<8x8xf32>, vector<8x8xf32> -> vector<8x8xf32>
    %c0_10 = arith.constant 0 : index
    %c0_11 = arith.constant 0 : index
    %c0_12 = arith.constant 0 : index
    %15 = vector.load %arg6[%c0_10, %c0_11, %c0_12] : memref<4x8x8xf32, #tpu.memory_space<vmem>>, vector<1x8x8xf32>
    %16 = vector.shape_cast %15 : vector<1x8x8xf32> to vector<8x8xf32>
    %17 = arith.addf %14, %16 : vector<8x8xf32>
    %c0_13 = arith.constant 0 : index
    %c0_14 = arith.constant 0 : index
    %c0_15 = arith.constant 0 : index
    %18 = vector.load %arg8[%c0_13, %c0_14, %c0_15] : memref<4x8x1xf32, #tpu.memory_space<vmem>>, vector<1x8x1xf32>
    %19 = vector.shape_cast %18 : vector<1x8x1xf32> to vector<8x1xf32>
    %cst_16 = arith.constant dense<0xFF800000> : vector<8xf32>
    %20 = vector.multi_reduction <maximumf>, %17, %cst_16 [1] : vector<8x8xf32> to vector<8xf32>
    %21 = vector.shape_cast %20 : vector<8xf32> to vector<8x1xf32>
    %22 = arith.maximumf %19, %21 : vector<8x1xf32>
    %23 = arith.subf %19, %22 : vector<8x1xf32>
    %24 = math.exp %23 : vector<8x1xf32>
    %25 = vector.broadcast %22 : vector<8x1xf32> to vector<8x8xf32>
    %26 = arith.subf %17, %25 : vector<8x8xf32>
    %27 = math.exp %26 : vector<8x8xf32>
    %c0_17 = arith.constant 0 : index
    %c0_18 = arith.constant 0 : index
    %c0_19 = arith.constant 0 : index
    %28 = vector.load %arg9[%c0_17, %c0_18, %c0_19] : memref<4x8x1xf32, #tpu.memory_space<vmem>>, vector<1x8x1xf32>
    %29 = vector.shape_cast %28 : vector<1x8x1xf32> to vector<8x1xf32>
    %30 = arith.mulf %24, %29 : vector<8x1xf32>
    %cst_20 = arith.constant dense<0.000000e+00> : vector<8xf32>
    %31 = vector.multi_reduction <add>, %27, %cst_20 [1] : vector<8x8xf32> to vector<8xf32>
    %32 = vector.shape_cast %31 : vector<8xf32> to vector<8x1xf32>
    %33 = arith.addf %30, %32 : vector<8x1xf32>
    %c0_21 = arith.constant 0 : index
    %c0_22 = arith.constant 0 : index
    %c0_23 = arith.constant 0 : index
    %34 = vector.load %arg9[%c0_21, %c0_22, %c0_23] : memref<4x8x1xf32, #tpu.memory_space<vmem>>, vector<1x8x1xf32>
    %35 = vector.shape_cast %34 : vector<1x8x1xf32> to vector<8x1xf32>
    %36 = vector.shape_cast %33 : vector<8x1xf32> to vector<1x8x1xf32>
    tpu.vector_store %arg9[%c0_21, %c0_22, %c0_23], %36 {strides = array<i32>} : memref<4x8x1xf32, #tpu.memory_space<vmem>>, vector<1x8x1xf32>,
    %c0_24 = arith.constant 0 : index
    %c0_25 = arith.constant 0 : index
    %c0_26 = arith.constant 0 : index
    %37 = vector.load %arg10[%c0_24, %c0_25, %c0_26] : memref<4x8x8xf32, #tpu.memory_space<vmem>>, vector<1x8x8xf32>
    %38 = vector.shape_cast %37 : vector<1x8x8xf32> to vector<8x8xf32>
    %39 = vector.broadcast %24 : vector<8x1xf32> to vector<8x8xf32>
    %40 = arith.mulf %39, %38 : vector<8x8xf32>
    %cst_27 = arith.constant dense<0.000000e+00> : vector<8x8xf32>
    %41 = tpu.matmul %27, %13, %cst_27 {dimension_numbers = #tpu.dot_dimension_numbers<[1], [0], [0], [1], [0, 0, 1, 1], [], []>} : vector<8x8xf32>, vector<8x8xf32>, vector<8x8xf32> -> vector<8x8xf32>
    %42 = arith.addf %40, %41 : vector<8x8xf32>
    %c0_28 = arith.constant 0 : index
    %c0_29 = arith.constant 0 : index
    %c0_30 = arith.constant 0 : index
    %43 = vector.load %arg10[%c0_28, %c0_29, %c0_30] : memref<4x8x8xf32, #tpu.memory_space<vmem>>, vector<1x8x8xf32>
    %44 = vector.shape_cast %43 : vector<1x8x8xf32> to vector<8x8xf32>
    %45 = vector.shape_cast %42 : vector<8x8xf32> to vector<1x8x8xf32>
    tpu.vector_store %arg10[%c0_28, %c0_29, %c0_30], %45 {strides = array<i32>} : memref<4x8x8xf32, #tpu.memory_space<vmem>>, vector<1x8x8xf32>,
    %c0_31 = arith.constant 0 : index
    %c0_32 = arith.constant 0 : index
    %c0_33 = arith.constant 0 : index
    %46 = vector.load %arg8[%c0_31, %c0_32, %c0_33] : memref<4x8x1xf32, #tpu.memory_space<vmem>>, vector<1x8x1xf32>
    %47 = vector.shape_cast %46 : vector<1x8x1xf32> to vector<8x1xf32>
    %48 = vector.shape_cast %22 : vector<8x1xf32> to vector<1x8x1xf32>
    tpu.vector_store %arg8[%c0_31, %c0_32, %c0_33], %48 {strides = array<i32>} : memref<4x8x1xf32, #tpu.memory_space<vmem>>, vector<1x8x1xf32>,
    %49 = vector.extract_strided_slice %4 {offsets = [0, 8], sizes = [8, 8], strides = [1, 1]} : vector<8x32xf32> to vector<8x8xf32>
    %cst_34 = arith.constant 0.353553385 : f32
    %50 = vector.broadcast %cst_34 : f32 to vector<8x8xf32>
    %51 = arith.mulf %49, %50 : vector<8x8xf32>
    %52 = vector.extract_strided_slice %6 {offsets = [0, 8], sizes = [8, 8], strides = [1, 1]} : vector<8x32xf32> to vector<8x8xf32>
    %53 = vector.extract_strided_slice %8 {offsets = [0, 8], sizes = [8, 8], strides = [1, 1]} : vector<8x32xf32> to vector<8x8xf32>
    %cst_35 = arith.constant dense<0.000000e+00> : vector<8x8xf32>
    %54 = tpu.matmul %51, %52, %cst_35 {dimension_numbers = #tpu.dot_dimension_numbers<[1], [1], [0], [0], [0, 0, 1, 0], [], []>} : vector<8x8xf32>, vector<8x8xf32>, vector<8x8xf32> -> vector<8x8xf32>
    %c1 = arith.constant 1 : index
    %c0_36 = arith.constant 0 : index
    %c0_37 = arith.constant 0 : index
    %55 = vector.load %arg6[%c1, %c0_36, %c0_37] : memref<4x8x8xf32, #tpu.memory_space<vmem>>, vector<1x8x8xf32>
    %56 = vector.shape_cast %55 : vector<1x8x8xf32> to vector<8x8xf32>
    %57 = arith.addf %54, %56 : vector<8x8xf32>
    %c1_38 = arith.constant 1 : index
    %c0_39 = arith.constant 0 : index
    %c0_40 = arith.constant 0 : index
    %58 = vector.load %arg8[%c1_38, %c0_39, %c0_40] : memref<4x8x1xf32, #tpu.memory_space<vmem>>, vector<1x8x1xf32>
    %59 = vector.shape_cast %58 : vector<1x8x1xf32> to vector<8x1xf32>
    %cst_41 = arith.constant dense<0xFF800000> : vector<8xf32>
    %60 = vector.multi_reduction <maximumf>, %57, %cst_41 [1] : vector<8x8xf32> to vector<8xf32>
    %61 = vector.shape_cast %60 : vector<8xf32> to vector<8x1xf32>
    %62 = arith.maximumf %59, %61 : vector<8x1xf32>
    %63 = arith.subf %59, %62 : vector<8x1xf32>
    %64 = math.exp %63 : vector<8x1xf32>
    %65 = vector.broadcast %62 : vector<8x1xf32> to vector<8x8xf32>
    %66 = arith.subf %57, %65 : vector<8x8xf32>
    %67 = math.exp %66 : vector<8x8xf32>
    %c1_42 = arith.constant 1 : index
    %c0_43 = arith.constant 0 : index
    %c0_44 = arith.constant 0 : index
    %68 = vector.load %arg9[%c1_42, %c0_43, %c0_44] : memref<4x8x1xf32, #tpu.memory_space<vmem>>, vector<1x8x1xf32>
    %69 = vector.shape_cast %68 : vector<1x8x1xf32> to vector<8x1xf32>
    %70 = arith.mulf %64, %69 : vector<8x1xf32>
    %cst_45 = arith.constant dense<0.000000e+00> : vector<8xf32>
    %71 = vector.multi_reduction <add>, %67, %cst_45 [1] : vector<8x8xf32> to vector<8xf32>
    %72 = vector.shape_cast %71 : vector<8xf32> to vector<8x1xf32>
    %73 = arith.addf %70, %72 : vector<8x1xf32>
    %c1_46 = arith.constant 1 : index
    %c0_47 = arith.constant 0 : index
    %c0_48 = arith.constant 0 : index
    %74 = vector.load %arg9[%c1_46, %c0_47, %c0_48] : memref<4x8x1xf32, #tpu.memory_space<vmem>>, vector<1x8x1xf32>
    %75 = vector.shape_cast %74 : vector<1x8x1xf32> to vector<8x1xf32>
    %76 = vector.shape_cast %73 : vector<8x1xf32> to vector<1x8x1xf32>
    tpu.vector_store %arg9[%c1_46, %c0_47, %c0_48], %76 {strides = array<i32>} : memref<4x8x1xf32, #tpu.memory_space<vmem>>, vector<1x8x1xf32>,
    %c1_49 = arith.constant 1 : index
    %c0_50 = arith.constant 0 : index
    %c0_51 = arith.constant 0 : index
    %77 = vector.load %arg10[%c1_49, %c0_50, %c0_51] : memref<4x8x8xf32, #tpu.memory_space<vmem>>, vector<1x8x8xf32>
    %78 = vector.shape_cast %77 : vector<1x8x8xf32> to vector<8x8xf32>
    %79 = vector.broadcast %64 : vector<8x1xf32> to vector<8x8xf32>
    %80 = arith.mulf %79, %78 : vector<8x8xf32>
    %cst_52 = arith.constant dense<0.000000e+00> : vector<8x8xf32>
    %81 = tpu.matmul %67, %53, %cst_52 {dimension_numbers = #tpu.dot_dimension_numbers<[1], [0], [0], [1], [0, 0, 1, 1], [], []>} : vector<8x8xf32>, vector<8x8xf32>, vector<8x8xf32> -> vector<8x8xf32>
    %82 = arith.addf %80, %81 : vector<8x8xf32>
    %c1_53 = arith.constant 1 : index
    %c0_54 = arith.constant 0 : index
    %c0_55 = arith.constant 0 : index
    %83 = vector.load %arg10[%c1_53, %c0_54, %c0_55] : memref<4x8x8xf32, #tpu.memory_space<vmem>>, vector<1x8x8xf32>
    %84 = vector.shape_cast %83 : vector<1x8x8xf32> to vector<8x8xf32>
    %85 = vector.shape_cast %82 : vector<8x8xf32> to vector<1x8x8xf32>
    tpu.vector_store %arg10[%c1_53, %c0_54, %c0_55], %85 {strides = array<i32>} : memref<4x8x8xf32, #tpu.memory_space<vmem>>, vector<1x8x8xf32>,
    %c1_56 = arith.constant 1 : index
    %c0_57 = arith.constant 0 : index
    %c0_58 = arith.constant 0 : index
    %86 = vector.load %arg8[%c1_56, %c0_57, %c0_58] : memref<4x8x1xf32, #tpu.memory_space<vmem>>, vector<1x8x1xf32>
    %87 = vector.shape_cast %86 : vector<1x8x1xf32> to vector<8x1xf32>
    %88 = vector.shape_cast %62 : vector<8x1xf32> to vector<1x8x1xf32>
    tpu.vector_store %arg8[%c1_56, %c0_57, %c0_58], %88 {strides = array<i32>} : memref<4x8x1xf32, #tpu.memory_space<vmem>>, vector<1x8x1xf32>,
    %89 = vector.extract_strided_slice %4 {offsets = [0, 16], sizes = [8, 8], strides = [1, 1]} : vector<8x32xf32> to vector<8x8xf32>
    %cst_59 = arith.constant 0.353553385 : f32
    %90 = vector.broadcast %cst_59 : f32 to vector<8x8xf32>
    %91 = arith.mulf %89, %90 : vector<8x8xf32>
    %92 = vector.extract_strided_slice %6 {offsets = [0, 16], sizes = [8, 8], strides = [1, 1]} : vector<8x32xf32> to vector<8x8xf32>
    %93 = vector.extract_strided_slice %8 {offsets = [0, 16], sizes = [8, 8], strides = [1, 1]} : vector<8x32xf32> to vector<8x8xf32>
    %cst_60 = arith.constant dense<0.000000e+00> : vector<8x8xf32>
    %94 = tpu.matmul %91, %92, %cst_60 {dimension_numbers = #tpu.dot_dimension_numbers<[1], [1], [0], [0], [0, 0, 1, 0], [], []>} : vector<8x8xf32>, vector<8x8xf32>, vector<8x8xf32> -> vector<8x8xf32>
    %c2 = arith.constant 2 : index
    %c0_61 = arith.constant 0 : index
    %c0_62 = arith.constant 0 : index
    %95 = vector.load %arg6[%c2, %c0_61, %c0_62] : memref<4x8x8xf32, #tpu.memory_space<vmem>>, vector<1x8x8xf32>
    %96 = vector.shape_cast %95 : vector<1x8x8xf32> to vector<8x8xf32>
    %97 = arith.addf %94, %96 : vector<8x8xf32>
    %c2_63 = arith.constant 2 : index
    %c0_64 = arith.constant 0 : index
    %c0_65 = arith.constant 0 : index
    %98 = vector.load %arg8[%c2_63, %c0_64, %c0_65] : memref<4x8x1xf32, #tpu.memory_space<vmem>>, vector<1x8x1xf32>
    %99 = vector.shape_cast %98 : vector<1x8x1xf32> to vector<8x1xf32>
    %cst_66 = arith.constant dense<0xFF800000> : vector<8xf32>
    %100 = vector.multi_reduction <maximumf>, %97, %cst_66 [1] : vector<8x8xf32> to vector<8xf32>
    %101 = vector.shape_cast %100 : vector<8xf32> to vector<8x1xf32>
    %102 = arith.maximumf %99, %101 : vector<8x1xf32>
    %103 = arith.subf %99, %102 : vector<8x1xf32>
    %104 = math.exp %103 : vector<8x1xf32>
    %105 = vector.broadcast %102 : vector<8x1xf32> to vector<8x8xf32>
    %106 = arith.subf %97, %105 : vector<8x8xf32>
    %107 = math.exp %106 : vector<8x8xf32>
    %c2_67 = arith.constant 2 : index
    %c0_68 = arith.constant 0 : index
    %c0_69 = arith.constant 0 : index
    %108 = vector.load %arg9[%c2_67, %c0_68, %c0_69] : memref<4x8x1xf32, #tpu.memory_space<vmem>>, vector<1x8x1xf32>
    %109 = vector.shape_cast %108 : vector<1x8x1xf32> to vector<8x1xf32>
    %110 = arith.mulf %104, %109 : vector<8x1xf32>
    %cst_70 = arith.constant dense<0.000000e+00> : vector<8xf32>
    %111 = vector.multi_reduction <add>, %107, %cst_70 [1] : vector<8x8xf32> to vector<8xf32>
    %112 = vector.shape_cast %111 : vector<8xf32> to vector<8x1xf32>
    %113 = arith.addf %110, %112 : vector<8x1xf32>
    %c2_71 = arith.constant 2 : index
    %c0_72 = arith.constant 0 : index
    %c0_73 = arith.constant 0 : index
    %114 = vector.load %arg9[%c2_71, %c0_72, %c0_73] : memref<4x8x1xf32, #tpu.memory_space<vmem>>, vector<1x8x1xf32>
    %115 = vector.shape_cast %114 : vector<1x8x1xf32> to vector<8x1xf32>
    %116 = vector.shape_cast %113 : vector<8x1xf32> to vector<1x8x1xf32>
    tpu.vector_store %arg9[%c2_71, %c0_72, %c0_73], %116 {strides = array<i32>} : memref<4x8x1xf32, #tpu.memory_space<vmem>>, vector<1x8x1xf32>,
    %c2_74 = arith.constant 2 : index
    %c0_75 = arith.constant 0 : index
    %c0_76 = arith.constant 0 : index
    %117 = vector.load %arg10[%c2_74, %c0_75, %c0_76] : memref<4x8x8xf32, #tpu.memory_space<vmem>>, vector<1x8x8xf32>
    %118 = vector.shape_cast %117 : vector<1x8x8xf32> to vector<8x8xf32>
    %119 = vector.broadcast %104 : vector<8x1xf32> to vector<8x8xf32>
    %120 = arith.mulf %119, %118 : vector<8x8xf32>
    %cst_77 = arith.constant dense<0.000000e+00> : vector<8x8xf32>
    %121 = tpu.matmul %107, %93, %cst_77 {dimension_numbers = #tpu.dot_dimension_numbers<[1], [0], [0], [1], [0, 0, 1, 1], [], []>} : vector<8x8xf32>, vector<8x8xf32>, vector<8x8xf32> -> vector<8x8xf32>
    %122 = arith.addf %120, %121 : vector<8x8xf32>
    %c2_78 = arith.constant 2 : index
    %c0_79 = arith.constant 0 : index
    %c0_80 = arith.constant 0 : index
    %123 = vector.load %arg10[%c2_78, %c0_79, %c0_80] : memref<4x8x8xf32, #tpu.memory_space<vmem>>, vector<1x8x8xf32>
    %124 = vector.shape_cast %123 : vector<1x8x8xf32> to vector<8x8xf32>
    %125 = vector.shape_cast %122 : vector<8x8xf32> to vector<1x8x8xf32>
    tpu.vector_store %arg10[%c2_78, %c0_79, %c0_80], %125 {strides = array<i32>} : memref<4x8x8xf32, #tpu.memory_space<vmem>>, vector<1x8x8xf32>,
    %c2_81 = arith.constant 2 : index
    %c0_82 = arith.constant 0 : index
    %c0_83 = arith.constant 0 : index
    %126 = vector.load %arg8[%c2_81, %c0_82, %c0_83] : memref<4x8x1xf32, #tpu.memory_space<vmem>>, vector<1x8x1xf32>
    %127 = vector.shape_cast %126 : vector<1x8x1xf32> to vector<8x1xf32>
    %128 = vector.shape_cast %102 : vector<8x1xf32> to vector<1x8x1xf32>
    tpu.vector_store %arg8[%c2_81, %c0_82, %c0_83], %128 {strides = array<i32>} : memref<4x8x1xf32, #tpu.memory_space<vmem>>, vector<1x8x1xf32>,
    %129 = vector.extract_strided_slice %4 {offsets = [0, 24], sizes = [8, 8], strides = [1, 1]} : vector<8x32xf32> to vector<8x8xf32>
    %cst_84 = arith.constant 0.353553385 : f32
    %130 = vector.broadcast %cst_84 : f32 to vector<8x8xf32>
    %131 = arith.mulf %129, %130 : vector<8x8xf32>
    %132 = vector.extract_strided_slice %6 {offsets = [0, 24], sizes = [8, 8], strides = [1, 1]} : vector<8x32xf32> to vector<8x8xf32>
    %133 = vector.extract_strided_slice %8 {offsets = [0, 24], sizes = [8, 8], strides = [1, 1]} : vector<8x32xf32> to vector<8x8xf32>
    %cst_85 = arith.constant dense<0.000000e+00> : vector<8x8xf32>
    %134 = tpu.matmul %131, %132, %cst_85 {dimension_numbers = #tpu.dot_dimension_numbers<[1], [1], [0], [0], [0, 0, 1, 0], [], []>} : vector<8x8xf32>, vector<8x8xf32>, vector<8x8xf32> -> vector<8x8xf32>
    %c3 = arith.constant 3 : index
    %c0_86 = arith.constant 0 : index
    %c0_87 = arith.constant 0 : index
    %135 = vector.load %arg6[%c3, %c0_86, %c0_87] : memref<4x8x8xf32, #tpu.memory_space<vmem>>, vector<1x8x8xf32>
    %136 = vector.shape_cast %135 : vector<1x8x8xf32> to vector<8x8xf32>
    %137 = arith.addf %134, %136 : vector<8x8xf32>
    %c3_88 = arith.constant 3 : index
    %c0_89 = arith.constant 0 : index
    %c0_90 = arith.constant 0 : index
    %138 = vector.load %arg8[%c3_88, %c0_89, %c0_90] : memref<4x8x1xf32, #tpu.memory_space<vmem>>, vector<1x8x1xf32>
    %139 = vector.shape_cast %138 : vector<1x8x1xf32> to vector<8x1xf32>
    %cst_91 = arith.constant dense<0xFF800000> : vector<8xf32>
    %140 = vector.multi_reduction <maximumf>, %137, %cst_91 [1] : vector<8x8xf32> to vector<8xf32>
    %141 = vector.shape_cast %140 : vector<8xf32> to vector<8x1xf32>
    %142 = arith.maximumf %139, %141 : vector<8x1xf32>
    %143 = arith.subf %139, %142 : vector<8x1xf32>
    %144 = math.exp %143 : vector<8x1xf32>
    %145 = vector.broadcast %142 : vector<8x1xf32> to vector<8x8xf32>
    %146 = arith.subf %137, %145 : vector<8x8xf32>
    %147 = math.exp %146 : vector<8x8xf32>
    %c3_92 = arith.constant 3 : index
    %c0_93 = arith.constant 0 : index
    %c0_94 = arith.constant 0 : index
    %148 = vector.load %arg9[%c3_92, %c0_93, %c0_94] : memref<4x8x1xf32, #tpu.memory_space<vmem>>, vector<1x8x1xf32>
    %149 = vector.shape_cast %148 : vector<1x8x1xf32> to vector<8x1xf32>
    %150 = arith.mulf %144, %149 : vector<8x1xf32>
    %cst_95 = arith.constant dense<0.000000e+00> : vector<8xf32>
    %151 = vector.multi_reduction <add>, %147, %cst_95 [1] : vector<8x8xf32> to vector<8xf32>
    %152 = vector.shape_cast %151 : vector<8xf32> to vector<8x1xf32>
    %153 = arith.addf %150, %152 : vector<8x1xf32>
    %c3_96 = arith.constant 3 : index
    %c0_97 = arith.constant 0 : index
    %c0_98 = arith.constant 0 : index
    %154 = vector.load %arg9[%c3_96, %c0_97, %c0_98] : memref<4x8x1xf32, #tpu.memory_space<vmem>>, vector<1x8x1xf32>
    %155 = vector.shape_cast %154 : vector<1x8x1xf32> to vector<8x1xf32>
    %156 = vector.shape_cast %153 : vector<8x1xf32> to vector<1x8x1xf32>
    tpu.vector_store %arg9[%c3_96, %c0_97, %c0_98], %156 {strides = array<i32>} : memref<4x8x1xf32, #tpu.memory_space<vmem>>, vector<1x8x1xf32>,
    %c3_99 = arith.constant 3 : index
    %c0_100 = arith.constant 0 : index
    %c0_101 = arith.constant 0 : index
    %157 = vector.load %arg10[%c3_99, %c0_100, %c0_101] : memref<4x8x8xf32, #tpu.memory_space<vmem>>, vector<1x8x8xf32>
    %158 = vector.shape_cast %157 : vector<1x8x8xf32> to vector<8x8xf32>
    %159 = vector.broadcast %144 : vector<8x1xf32> to vector<8x8xf32>
    %160 = arith.mulf %159, %158 : vector<8x8xf32>
    %cst_102 = arith.constant dense<0.000000e+00> : vector<8x8xf32>
    %161 = tpu.matmul %147, %133, %cst_102 {dimension_numbers = #tpu.dot_dimension_numbers<[1], [0], [0], [1], [0, 0, 1, 1], [], []>} : vector<8x8xf32>, vector<8x8xf32>, vector<8x8xf32> -> vector<8x8xf32>
    %162 = arith.addf %160, %161 : vector<8x8xf32>
    %c3_103 = arith.constant 3 : index
    %c0_104 = arith.constant 0 : index
    %c0_105 = arith.constant 0 : index
    %163 = vector.load %arg10[%c3_103, %c0_104, %c0_105] : memref<4x8x8xf32, #tpu.memory_space<vmem>>, vector<1x8x8xf32>
    %164 = vector.shape_cast %163 : vector<1x8x8xf32> to vector<8x8xf32>
    %165 = vector.shape_cast %162 : vector<8x8xf32> to vector<1x8x8xf32>
    tpu.vector_store %arg10[%c3_103, %c0_104, %c0_105], %165 {strides = array<i32>} : memref<4x8x8xf32, #tpu.memory_space<vmem>>, vector<1x8x8xf32>,
    %c3_106 = arith.constant 3 : index
    %c0_107 = arith.constant 0 : index
    %c0_108 = arith.constant 0 : index
    %166 = vector.load %arg8[%c3_106, %c0_107, %c0_108] : memref<4x8x1xf32, #tpu.memory_space<vmem>>, vector<1x8x1xf32>
    %167 = vector.shape_cast %166 : vector<1x8x1xf32> to vector<8x1xf32>
    %168 = vector.shape_cast %142 : vector<8x1xf32> to vector<1x8x1xf32>
    tpu.vector_store %arg8[%c3_106, %c0_107, %c0_108], %168 {strides = array<i32>} : memref<4x8x1xf32, #tpu.memory_space<vmem>>, vector<1x8x1xf32>,
    %c0_i32_109 = arith.constant 0 : i32
    %169 = arith.cmpi eq, %arg2, %c0_i32_109 : i32
    %170 = arith.extui %169 : i1 to i32
    %c0_i32_110 = arith.constant 0 : i32
    %171 = arith.cmpi ne, %170, %c0_i32_110 : i32
    scf.if %171 {
      %c0_111 = arith.constant 0 : index
      %c0_112 = arith.constant 0 : index
      %c0_113 = arith.constant 0 : index
      %172 = vector.load %arg10[%c0_111, %c0_112, %c0_113] : memref<4x8x8xf32, #tpu.memory_space<vmem>>, vector<1x8x8xf32>
      %173 = vector.shape_cast %172 : vector<1x8x8xf32> to vector<8x8xf32>
      %c0_114 = arith.constant 0 : index
      %c0_115 = arith.constant 0 : index
      %c0_116 = arith.constant 0 : index
      %174 = vector.load %arg9[%c0_114, %c0_115, %c0_116] : memref<4x8x1xf32, #tpu.memory_space<vmem>>, vector<1x8x1xf32>
      %175 = vector.shape_cast %174 : vector<1x8x1xf32> to vector<8x1xf32>
      %176 = tpu.reciprocal %175 {approx = true} : vector<8x1xf32> -> vector<8x1xf32>
      %177 = vector.broadcast %176 : vector<8x1xf32> to vector<8x8xf32>
      %178 = arith.mulf %173, %177 : vector<8x8xf32>
      %c1_117 = arith.constant 1 : index
      %c0_118 = arith.constant 0 : index
      %c0_119 = arith.constant 0 : index
      %179 = vector.load %arg10[%c1_117, %c0_118, %c0_119] : memref<4x8x8xf32, #tpu.memory_space<vmem>>, vector<1x8x8xf32>
      %180 = vector.shape_cast %179 : vector<1x8x8xf32> to vector<8x8xf32>
      %c1_120 = arith.constant 1 : index
      %c0_121 = arith.constant 0 : index
      %c0_122 = arith.constant 0 : index
      %181 = vector.load %arg9[%c1_120, %c0_121, %c0_122] : memref<4x8x1xf32, #tpu.memory_space<vmem>>, vector<1x8x1xf32>
      %182 = vector.shape_cast %181 : vector<1x8x1xf32> to vector<8x1xf32>
      %183 = tpu.reciprocal %182 {approx = true} : vector<8x1xf32> -> vector<8x1xf32>
      %184 = vector.broadcast %183 : vector<8x1xf32> to vector<8x8xf32>
      %185 = arith.mulf %180, %184 : vector<8x8xf32>
      %c2_123 = arith.constant 2 : index
      %c0_124 = arith.constant 0 : index
      %c0_125 = arith.constant 0 : index
      %186 = vector.load %arg10[%c2_123, %c0_124, %c0_125] : memref<4x8x8xf32, #tpu.memory_space<vmem>>, vector<1x8x8xf32>
      %187 = vector.shape_cast %186 : vector<1x8x8xf32> to vector<8x8xf32>
      %c2_126 = arith.constant 2 : index
      %c0_127 = arith.constant 0 : index
      %c0_128 = arith.constant 0 : index
      %188 = vector.load %arg9[%c2_126, %c0_127, %c0_128] : memref<4x8x1xf32, #tpu.memory_space<vmem>>, vector<1x8x1xf32>
      %189 = vector.shape_cast %188 : vector<1x8x1xf32> to vector<8x1xf32>
      %190 = tpu.reciprocal %189 {approx = true} : vector<8x1xf32> -> vector<8x1xf32>
      %191 = vector.broadcast %190 : vector<8x1xf32> to vector<8x8xf32>
      %192 = arith.mulf %187, %191 : vector<8x8xf32>
      %c3_129 = arith.constant 3 : index
      %c0_130 = arith.constant 0 : index
      %c0_131 = arith.constant 0 : index
      %193 = vector.load %arg10[%c3_129, %c0_130, %c0_131] : memref<4x8x8xf32, #tpu.memory_space<vmem>>, vector<1x8x8xf32>
      %194 = vector.shape_cast %193 : vector<1x8x8xf32> to vector<8x8xf32>
      %c3_132 = arith.constant 3 : index
      %c0_133 = arith.constant 0 : index
      %c0_134 = arith.constant 0 : index
      %195 = vector.load %arg9[%c3_132, %c0_133, %c0_134] : memref<4x8x1xf32, #tpu.memory_space<vmem>>, vector<1x8x1xf32>
      %196 = vector.shape_cast %195 : vector<1x8x1xf32> to vector<8x1xf32>
      %197 = tpu.reciprocal %196 {approx = true} : vector<8x1xf32> -> vector<8x1xf32>
      %198 = vector.broadcast %197 : vector<8x1xf32> to vector<8x8xf32>
      %199 = arith.mulf %194, %198 : vector<8x8xf32>
      %200 = tpu.concatenate %178, %185, %192, %199 in 1 : vector<8x8xf32>, vector<8x8xf32>, vector<8x8xf32>, vector<8x8xf32> -> vector<8x32xf32>
      %c0_135 = arith.constant 0 : index
      %c0_136 = arith.constant 0 : index
      %c0_137 = arith.constant 0 : index
      %201 = vector.load %arg7[%c0_135, %c0_136, %c0_137] : memref<1x8x32xf32, #tpu.memory_space<vmem>>, vector<1x8x32xf32>
      %202 = vector.shape_cast %201 : vector<1x8x32xf32> to vector<8x32xf32>
      %203 = vector.shape_cast %200 : vector<8x32xf32> to vector<1x8x32xf32>
      tpu.vector_store %arg7[%c0_135, %c0_136, %c0_137], %203 {strides = array<i32>} : memref<1x8x32xf32, #tpu.memory_space<vmem>>, vector<1x8x32xf32>,
    } else {
    }
    return
  }
  func.func @transform_0(%arg0: i32, %arg1: i32, %arg2: i32) -> (i32, i32, i32) {
    %c0_i32 = arith.constant 0 : i32
    %c0_i32_0 = arith.constant 0 : i32
    return %arg0, %arg1, %c0_i32 : i32, i32, i32
  }
  func.func @transform_1(%arg0: i32, %arg1: i32, %arg2: i32) -> (i32, i32, i32) {
    %c0_i32 = arith.constant 0 : i32
    %c0_i32_0 = arith.constant 0 : i32
    return %arg0, %arg2, %c0_i32 : i32, i32, i32
  }
  func.func @transform_2(%arg0: i32, %arg1: i32, %arg2: i32) -> (i32, i32, i32) {
    %c0_i32 = arith.constant 0 : i32
    %c0_i32_0 = arith.constant 0 : i32
    return %arg0, %arg2, %c0_i32 : i32, i32, i32
  }
  func.func @transform_3(%arg0: i32, %arg1: i32, %arg2: i32) -> (i32, i32, i32) {
    %c0_i32 = arith.constant 0 : i32
    %c0_i32_0 = arith.constant 0 : i32
    return %c0_i32, %arg1, %arg2 : i32, i32, i32
  }
  func.func @transform_4(%arg0: i32, %arg1: i32, %arg2: i32) -> (i32, i32, i32) {
    %c0_i32 = arith.constant 0 : i32
    %c0_i32_0 = arith.constant 0 : i32
    return %arg0, %arg1, %c0_i32 : i32, i32, i32
  }
}

module attributes {stable_mosaic.version = 11 : i64} {
  func.func @_linear_kernel(%arg0: i32, %arg1: i32, %arg2: i32, %arg3: memref<16x512xf32, #tpu.memory_space<vmem>>, %arg4: memref<512x32xf32, #tpu.memory_space<vmem>>, %arg5: memref<1x32xf32, #tpu.memory_space<vmem>>, %arg6: memref<16x32xf32, #tpu.memory_space<vmem>>, %arg7: memref<16x32xf32, #tpu.memory_space<vmem>>, %arg8: memref<16x32xf32, #tpu.memory_space<vmem>>) attributes {dimension_semantics = [#tpu.dimension_semantics<parallel>, #tpu.dimension_semantics<parallel>, #tpu.dimension_semantics<arbitrary>], iteration_bounds = array<i64: 1, 1, 4>, scalar_prefetch = 0 : i64, scratch_operands = 1 : i64, tpu.core_type = #tpu.core_type<tc>, window_params = [{transform_indices = @transform_0, window_bounds = array<i64: 16, 512>}, {transform_indices = @transform_1, window_bounds = array<i64: 512, 32>}, {transform_indices = @transform_2, window_bounds = array<i64: 1, 32>}, {transform_indices = @transform_3, window_bounds = array<i64: 16, 32>}, {transform_indices = @transform_4, window_bounds = array<i64: 16, 32>}]} {
    %c0_i32 = arith.constant 0 : i32
    %0 = arith.cmpi eq, %arg2, %c0_i32 : i32
    %1 = arith.extui %0 : i1 to i32
    %c0_i32_0 = arith.constant 0 : i32
    %2 = arith.cmpi ne, %1, %c0_i32_0 : i32
    scf.if %2 {
      %cst_9 = arith.constant 0.000000e+00 : f32
      %12 = vector.broadcast %cst_9 : f32 to vector<16x32xf32>
      %c0_10 = arith.constant 0 : index
      %c0_11 = arith.constant 0 : index
      %13 = vector.load %arg8[%c0_10, %c0_11] : memref<16x32xf32, #tpu.memory_space<vmem>>, vector<16x32xf32>
      tpu.vector_store %arg8[%c0_10, %c0_11], %12 {strides = array<i32>} : memref<16x32xf32, #tpu.memory_space<vmem>>, vector<16x32xf32>,
    } else {
    }
    %c0 = arith.constant 0 : index
    %c0_1 = arith.constant 0 : index
    %3 = vector.load %arg3[%c0, %c0_1] : memref<16x512xf32, #tpu.memory_space<vmem>>, vector<16x512xf32>
    %c0_2 = arith.constant 0 : index
    %c0_3 = arith.constant 0 : index
    %4 = vector.load %arg8[%c0_2, %c0_3] : memref<16x32xf32, #tpu.memory_space<vmem>>, vector<16x32xf32>
    %c0_4 = arith.constant 0 : index
    %c0_5 = arith.constant 0 : index
    %5 = vector.load %arg4[%c0_4, %c0_5] : memref<512x32xf32, #tpu.memory_space<vmem>>, vector<512x32xf32>
    %cst = arith.constant dense<0.000000e+00> : vector<16x32xf32>
    %6 = tpu.matmul %3, %5, %cst {dimension_numbers = #tpu.dot_dimension_numbers<[1], [0], [0], [1], [0, 0, 1, 1], [], []>} : vector<16x512xf32>, vector<512x32xf32>, vector<16x32xf32> -> vector<16x32xf32>
    %7 = arith.addf %4, %6 : vector<16x32xf32>
    %c0_6 = arith.constant 0 : index
    %c0_7 = arith.constant 0 : index
    %8 = vector.load %arg8[%c0_6, %c0_7] : memref<16x32xf32, #tpu.memory_space<vmem>>, vector<16x32xf32>
    tpu.vector_store %arg8[%c0_6, %c0_7], %7 {strides = array<i32>} : memref<16x32xf32, #tpu.memory_space<vmem>>, vector<16x32xf32>,
    %c3_i32 = arith.constant 3 : i32
    %9 = arith.cmpi eq, %arg2, %c3_i32 : i32
    %10 = arith.extui %9 : i1 to i32
    %c0_i32_8 = arith.constant 0 : i32
    %11 = arith.cmpi ne, %10, %c0_i32_8 : i32
    scf.if %11 {
      %c0_9 = arith.constant 0 : index
      %c0_10 = arith.constant 0 : index
      %12 = vector.load %arg8[%c0_9, %c0_10] : memref<16x32xf32, #tpu.memory_space<vmem>>, vector<16x32xf32>
      %c0_11 = arith.constant 0 : index
      %c0_12 = arith.constant 0 : index
      %13 = vector.load %arg5[%c0_11, %c0_12] : memref<1x32xf32, #tpu.memory_space<vmem>>, vector<1x32xf32>
      %14 = vector.broadcast %13 : vector<1x32xf32> to vector<16x32xf32>
      %15 = arith.addf %12, %14 : vector<16x32xf32>
      %c0_13 = arith.constant 0 : index
      %c0_14 = arith.constant 0 : index
      %16 = vector.load %arg6[%c0_13, %c0_14] : memref<16x32xf32, #tpu.memory_space<vmem>>, vector<16x32xf32>
      %17 = arith.addf %15, %16 : vector<16x32xf32>
      %c0_15 = arith.constant 0 : index
      %c0_16 = arith.constant 0 : index
      %18 = vector.load %arg7[%c0_15, %c0_16] : memref<16x32xf32, #tpu.memory_space<vmem>>, vector<16x32xf32>
      tpu.vector_store %arg7[%c0_15, %c0_16], %17 {strides = array<i32>} : memref<16x32xf32, #tpu.memory_space<vmem>>, vector<16x32xf32>,
    } else {
    }
    return
  }
  func.func @transform_0(%arg0: i32, %arg1: i32, %arg2: i32) -> (i32, i32) {
    %c0_i32 = arith.constant 0 : i32
    return %arg0, %arg2 : i32, i32
  }
  func.func @transform_1(%arg0: i32, %arg1: i32, %arg2: i32) -> (i32, i32) {
    %c0_i32 = arith.constant 0 : i32
    return %arg2, %arg1 : i32, i32
  }
  func.func @transform_2(%arg0: i32, %arg1: i32, %arg2: i32) -> (i32, i32) {
    %c0_i32 = arith.constant 0 : i32
    %c0_i32_0 = arith.constant 0 : i32
    return %c0_i32, %arg1 : i32, i32
  }
  func.func @transform_3(%arg0: i32, %arg1: i32, %arg2: i32) -> (i32, i32) {
    %c0_i32 = arith.constant 0 : i32
    return %arg0, %arg1 : i32, i32
  }
  func.func @transform_4(%arg0: i32, %arg1: i32, %arg2: i32) -> (i32, i32) {
    %c0_i32 = arith.constant 0 : i32
    return %arg0, %arg1 : i32, i32
  }
}

module attributes {stable_mosaic.version = 11 : i64} {
  func.func @_layernorm_kernel(%arg0: i32, %arg1: memref<16x32xf32, #tpu.memory_space<vmem>>, %arg2: memref<1x32xf32, #tpu.memory_space<vmem>>, %arg3: memref<1x32xf32, #tpu.memory_space<vmem>>, %arg4: memref<16x32xf32, #tpu.memory_space<vmem>>) attributes {dimension_semantics = [#tpu.dimension_semantics<parallel>], iteration_bounds = array<i64: 1>, scalar_prefetch = 0 : i64, scratch_operands = 0 : i64, tpu.core_type = #tpu.core_type<tc>, window_params = [{transform_indices = @transform_0, window_bounds = array<i64: 16, 32>}, {pipeline_mode = #tpu.pipeline_mode<synchronous>, transform_indices = @transform_1, window_bounds = array<i64: 1, 32>}, {pipeline_mode = #tpu.pipeline_mode<synchronous>, transform_indices = @transform_2, window_bounds = array<i64: 1, 32>}, {transform_indices = @transform_3, window_bounds = array<i64: 16, 32>}]} {
    %c0 = arith.constant 0 : index
    %c0_0 = arith.constant 0 : index
    %0 = vector.load %arg1[%c0, %c0_0] : memref<16x32xf32, #tpu.memory_space<vmem>>, vector<16x32xf32>
    %cst = arith.constant dense<0.000000e+00> : vector<16xf32>
    %1 = vector.multi_reduction <add>, %0, %cst [1] : vector<16x32xf32> to vector<16xf32>
    %2 = vector.shape_cast %1 : vector<16xf32> to vector<16x1xf32>
    %cst_1 = arith.constant 3.200000e+01 : f32
    %3 = vector.broadcast %cst_1 : f32 to vector<16x1xf32>
    %4 = arith.divf %2, %3 : vector<16x1xf32>
    %5 = vector.broadcast %4 : vector<16x1xf32> to vector<16x32xf32>
    %6 = arith.subf %0, %5 : vector<16x32xf32>
    %7 = arith.mulf %6, %6 : vector<16x32xf32>
    %cst_2 = arith.constant dense<0.000000e+00> : vector<16xf32>
    %8 = vector.multi_reduction <add>, %7, %cst_2 [1] : vector<16x32xf32> to vector<16xf32>
    %9 = vector.shape_cast %8 : vector<16xf32> to vector<16x1xf32>
    %cst_3 = arith.constant 3.200000e+01 : f32
    %10 = vector.broadcast %cst_3 : f32 to vector<16x1xf32>
    %11 = arith.divf %9, %10 : vector<16x1xf32>
    %12 = vector.broadcast %4 : vector<16x1xf32> to vector<16x32xf32>
    %13 = arith.subf %0, %12 : vector<16x32xf32>
    %cst_4 = arith.constant 9.99999974E-6 : f32
    %14 = vector.broadcast %cst_4 : f32 to vector<16x1xf32>
    %15 = arith.addf %11, %14 : vector<16x1xf32>
    %16 = math.rsqrt %15 : vector<16x1xf32>
    %17 = vector.broadcast %16 : vector<16x1xf32> to vector<16x32xf32>
    %18 = arith.mulf %13, %17 : vector<16x32xf32>
    %c0_5 = arith.constant 0 : index
    %c0_6 = arith.constant 0 : index
    %19 = vector.load %arg2[%c0_5, %c0_6] : memref<1x32xf32, #tpu.memory_space<vmem>>, vector<1x32xf32>
    %20 = vector.broadcast %19 : vector<1x32xf32> to vector<16x32xf32>
    %21 = arith.mulf %18, %20 : vector<16x32xf32>
    %c0_7 = arith.constant 0 : index
    %c0_8 = arith.constant 0 : index
    %22 = vector.load %arg3[%c0_7, %c0_8] : memref<1x32xf32, #tpu.memory_space<vmem>>, vector<1x32xf32>
    %23 = vector.broadcast %22 : vector<1x32xf32> to vector<16x32xf32>
    %24 = arith.addf %21, %23 : vector<16x32xf32>
    %c0_9 = arith.constant 0 : index
    %c0_10 = arith.constant 0 : index
    %25 = vector.load %arg4[%c0_9, %c0_10] : memref<16x32xf32, #tpu.memory_space<vmem>>, vector<16x32xf32>
    tpu.vector_store %arg4[%c0_9, %c0_10], %24 {strides = array<i32>} : memref<16x32xf32, #tpu.memory_space<vmem>>, vector<16x32xf32>,
    return
  }
  func.func @transform_0(%arg0: i32) -> (i32, i32) {
    %c0_i32 = arith.constant 0 : i32
    %c0_i32_0 = arith.constant 0 : i32
    return %arg0, %c0_i32 : i32, i32
  }
  func.func @transform_1(%arg0: i32) -> (i32, i32) {
    %c0_i32 = arith.constant 0 : i32
    %c0_i32_0 = arith.constant 0 : i32
    %c0_i32_1 = arith.constant 0 : i32
    return %c0_i32, %c0_i32_0 : i32, i32
  }
  func.func @transform_2(%arg0: i32) -> (i32, i32) {
    %c0_i32 = arith.constant 0 : i32
    %c0_i32_0 = arith.constant 0 : i32
    %c0_i32_1 = arith.constant 0 : i32
    return %c0_i32, %c0_i32_0 : i32, i32
  }
  func.func @transform_3(%arg0: i32) -> (i32, i32) {
    %c0_i32 = arith.constant 0 : i32
    %c0_i32_0 = arith.constant 0 : i32
    return %arg0, %c0_i32 : i32, i32
  }
}

</mosaic_0001>

<bundles_post_ra>
// kernel: compressive_transformer_forward.11
= control target key start
LH: loop header
LB: loop body
LE: loop exit
PB: predicated region body
PF: predicated region fallthrough
CT: control target
= control target key end

     0   :  { %vm29_vm0 = vcmask 261120   ;;  %vm24_vm1 = vcmask 785408   ;;  %v214_v18 = vmov 0.0   ;;  %s290_s0 = inlined_call_operand.vmem [shape: f32[16,32], index: 0, kind: input, shape index: {}]   ;;  %s291_s1 = inlined_call_operand.vmem [shape: f32[32,96], index: 1, kind: input, shape index: {}]   ;;  %s292_s3 = inlined_call_operand.vmem [shape: f32[1,32], index: 3, kind: input, shape index: {}]   ;;  %s293_s4 = inlined_call_operand.vmem [shape: f32[1,32], index: 4, kind: input, shape index: {}]   ;;  %s294_s2 = inlined_call_operand.vmem [shape: f32[1,96], index: 2, kind: input, shape index: {}]   ;;  %s295_s5 = inlined_call_operand.vmem [shape: f32[16,96], index: 5, kind: output, shape index: {}]  }
   0x1   :  { %v27_v0 = vld [vmem:[%s290_s0] sm:$0xff]  ;;  %v28_v1 = vld [vmem:[%s290_s0 + $0x8] sm:$0xff]  ;;  %v80_v14 = vld [vmem:[%s291_s1 + $0x18] sm:$0xff]  ;;  %26 = vst.msk [vmem:[#allocation2 + $0x8] sm:$0xff] %vm24_vm1, %v214_v18 }
   0x2   :  { %v30_v2 = vsel %vm29_vm0, %v27_v0, 0.0  ;;  %v33_v3 = vsel %vm29_vm0, %v28_v1, 0.0  ;;  %v79_v15 = vld [vmem:[%s291_s1 + $0x10] sm:$0xff]  ;;  %198 = vmatprep.subr.mxu0 %v80_v14  ;;  %v78_v16 = vld [vmem:[%s291_s1 + $0x8] sm:$0xff]  ;;  %v77_v17 = vld [vmem:[%s291_s1] sm:$0xff]  ;;  %25 = vst.msk [vmem:[#allocation2] sm:$0xff] %vm24_vm1, %v214_v18 }
   0x3   :  { %31 = vadd.xlane.f32.xlu0 %v30_v2  ;;  %199 = vmatpush3.msra.mxu0 %v80_v14  ;;  %v187_v26 = vld [vmem:[%s292_s3] ss:$0 sm:$0xff] }
   0x4   :  { %200 = vmatprep.subr.mxu0 %v79_v15  ;;  %v188_v28 = vld [vmem:[%s293_s4] ss:$0 sm:$0xff] }
   0x5   :  { %201 = vmatpush3.msra.mxu0 %v79_v15  ;;  %v191_v41 = vld [vmem:[%s294_s2] ss:$0 sm:$0xff] }
   0x6   :  { %202 = vmatprep.subr.mxu0 %v78_v16 }
   0x7   :  { %34 = vadd.xlane.f32.xlu0 %v33_v3  ;;  %203 = vmatpush3.msra.mxu0 %v78_v16 }
   0x8   :  { %204 = vmatprep.subr.mxu0 %v77_v17  ;;  %v76_v35 = vld [vmem:[#allocation2 + $0x8] sm:$0xff] }
   0x9   :  { %205 = vmatpush3.msra.mxu0 %v77_v17  ;;  %v75_v37 = vld [vmem:[#allocation2] sm:$0xff] }
  0x8c   :  { %v32_v4 = vpop.xlane.xlu0 %31 }
  0x8d   :  { %v37_v5 = vmul.f32 0.03125, %v32_v4 }
  0x8f   :  { %v39_v6 = vsub.f32 %v27_v0, %v37_v5 }
  0x90   :  { %v35_v7 = vpop.xlane.xlu0 %34 }
  0x91   :  { %v38_v8 = vmul.f32 0.03125, %v35_v7  ;;  %v41_v9 = vmul.f32 %v39_v6, %v39_v6 }
  0x93   :  { %v40_v10 = vsub.f32 %v28_v1, %v38_v8  ;;  %v43_v11 = vsel %vm29_vm0, %v41_v9, 0.0 }
  0x94   :  { %44 = vadd.xlane.f32.xlu1 %v43_v11 }
  0x95   :  { %v42_v12 = vmul.f32 %v40_v10, %v40_v10 }
  0x97   :  { %v46_v13 = vsel %vm29_vm0, %v42_v12, 0.0 }
  0x98   :  { %47 = vadd.xlane.f32.xlu1 %v46_v13 }
 0x11d   :  { %v45_v19 = vpop.xlane.xlu1 %44 }
 0x11e   :  { %v49_v20 = vmul.f32 0.03125, %v45_v19 }
 0x120   :  { %v51_v21 = vadd.f32 1e-05, %v49_v20 }
 0x121   :  { %v48_v22 = vpop.xlane.xlu1 %47 }
 0x122   :  { %210 = vrsqrt.f32 %v51_v21  ;;  %v50_v23 = vmul.f32 0.03125, %v48_v22 }
 0x124   :  { %v52_v24 = vadd.f32 1e-05, %v50_v23 }
 0x126   :  { %212 = vrsqrt.f32 %v52_v24 }
 0x12f   :  { %v211_v25 = vpop.eup %210 }
 0x130   :  { %v55_v27 = vmul.f32 %v211_v25, %v39_v6 }
 0x132   :  { %v64_v29 = vmul.f32 %v187_v26, %v55_v27 }
 0x133   :  { %v213_v30 = vpop.eup %212 }
 0x134   :  { %v56_v31 = vmul.f32 %v213_v30, %v40_v10  ;;  %v73_v32 = vadd.f32 %v188_v28, %v64_v29 }
 0x136   :  { %v65_v33 = vmul.f32 %v187_v26, %v56_v31  ;;  %206 = vmatprep.mubr.msk.f32.mxu0 %vm29_vm0, %v73_v32 }
 0x138   :  { %v74_v34 = vadd.f32 %v188_v28, %v65_v33 }
 0x13a   :  { %207 = vmatmul.mubr.msk.f32.vlgmr.msra.gmra.mxu0 %vm29_vm0, %v74_v34 }
 0x1fa   :  { %v208_v36 = vpop.f32.mrf.mxu0 }
 0x1fb   :  { %v163_v38 = vadd.f32 %v208_v36, %v76_v35 }
 0x1fc   :  { %v153_v39 = vpop.f32.mrf.mxu0 }
 0x1fd   :  { %166 = vst.msk [vmem:[#allocation2 + $0x8] sm:$0xff] %vm24_vm1, %v163_v38  ;;  %v162_v40 = vadd.f32 %v153_v39, %v75_v37 }
 0x1ff   :  { %165 = vst.msk [vmem:[#allocation2] sm:$0xff] %vm24_vm1, %v162_v40 }
 0x204   :  { %v171_v42 = vld [vmem:[#allocation2 + $0x8] sm:$0xff] }
 0x205   :  { %v180_v43 = vadd.f32 %v191_v41, %v171_v42 }
 0x206   :  { %v170_v44 = vld [vmem:[#allocation2] sm:$0xff] }
 0x207   :  { %182 = vst.msk [vmem:[%s295_s5 + $0x8] sm:$0xff] %vm24_vm1, %v180_v43  ;;  %v179_v45 = vadd.f32 %v191_v41, %v170_v44 }
 0x209   :  { %181 = vst.msk [vmem:[%s295_s5] sm:$0xff] %vm24_vm1, %v179_v45 }

// kernel: compressive_transformer_forward.13
= control target key start
LH: loop header
LB: loop body
LE: loop exit
PB: predicated region body
PF: predicated region fallthrough
CT: control target
= control target key end

     0   :  { %vm21_vm0 = vcmask 261120   ;;  %v163_v2 = vmov 0.0   ;;  %s230_s1 = inlined_call_operand.vmem [shape: f32[32,32], index: 1, kind: input, shape index: {}]   ;;  %s231_s0 = inlined_call_operand.vmem [shape: f32[16,32], index: 0, kind: input, shape index: {}]   ;;  %s232_s2 = inlined_call_operand.vmem [shape: f32[1,32], index: 2, kind: input, shape index: {}]   ;;  %s233_s3 = inlined_call_operand.vmem [shape: f32[16,32], index: 3, kind: input, shape index: {}]   ;;  %s234_s4 = inlined_call_operand.vmem [shape: f32[16,32], index: 4, kind: output, shape index: {}]  }
   0x1   :  { %v31_v0 = vld [vmem:[%s230_s1 + $0x18] sm:$0xff]  ;;  %v30_v1 = vld [vmem:[%s230_s1 + $0x10] sm:$0xff]  ;;  %23 = vst.msk [vmem:[#allocation2 + $0x8] sm:$0xff] %vm21_vm0, %v163_v2  ;;  %22 = vst.msk [vmem:[#allocation2] sm:$0xff] %vm21_vm0, %v163_v2 }
   0x2   :  { %151 = vmatprep.subr.mxu0 %v31_v0  ;;  %v24_v3 = vld [vmem:[%s231_s0] sm:$0xff]  ;;  %v29_v4 = vld [vmem:[%s230_s1 + $0x8] sm:$0xff] }
   0x3   :  { %152 = vmatpush3.msra.mxu0 %v31_v0  ;;  %159 = vmatprep.mubr.msk.f32.mxu0 %vm21_vm0, %v24_v3  ;;  %v28_v5 = vld [vmem:[%s230_s1] sm:$0xff]  ;;  %v25_v6 = vld [vmem:[%s231_s0 + $0x8] sm:$0xff] }
   0x4   :  { %153 = vmatprep.subr.mxu0 %v30_v1  ;;  %v144_v13 = vld [vmem:[%s232_s2] ss:$0 sm:$0xff]  ;;  %v133_v15 = vld [vmem:[%s233_s3 + $0x8] sm:$0xff] }
   0x5   :  { %154 = vmatpush3.msra.mxu0 %v30_v1  ;;  %v132_v18 = vld [vmem:[%s233_s3] sm:$0xff] }
   0x6   :  { %155 = vmatprep.subr.mxu0 %v29_v4 }
   0x7   :  { %156 = vmatpush3.msra.mxu0 %v29_v4 }
   0x8   :  { %157 = vmatprep.subr.mxu0 %v28_v5  ;;  %v27_v7 = vld [vmem:[#allocation2 + $0x8] sm:$0xff]  ;;  %v26_v9 = vld [vmem:[#allocation2] sm:$0xff] }
   0x9   :  { %158 = vmatpush3.msra.mxu0 %v28_v5 }
   0xa   :  { %160 = vmatmul.mubr.msk.f32.vlgmr.msra.gmra.mxu0 %vm21_vm0, %v25_v6 }
  0xca   :  { %v161_v8 = vpop.f32.mrf.mxu0 }
  0xcb   :  { %v115_v10 = vadd.f32 %v161_v8, %v27_v7 }
  0xcc   :  { %v105_v11 = vpop.f32.mrf.mxu0 }
  0xcd   :  { %117 = vst.msk [vmem:[#allocation2 + $0x8] sm:$0xff] %vm21_vm0, %v115_v10  ;;  %v114_v12 = vadd.f32 %v105_v11, %v26_v9 }
  0xcf   :  { %116 = vst.msk [vmem:[#allocation2] sm:$0xff] %vm21_vm0, %v114_v12 }
  0xd4   :  { %v122_v14 = vld [vmem:[#allocation2 + $0x8] sm:$0xff] }
  0xd5   :  { %v131_v16 = vadd.f32 %v144_v13, %v122_v14 }
  0xd6   :  { %v121_v17 = vld [vmem:[#allocation2] sm:$0xff] }
  0xd7   :  { %v135_v19 = vadd.f32 %v133_v15, %v131_v16  ;;  %v130_v20 = vadd.f32 %v144_v13, %v121_v17 }
  0xd9   :  { %137 = vst.msk [vmem:[%s234_s4 + $0x8] sm:$0xff] %vm21_vm0, %v135_v19  ;;  %v134_v21 = vadd.f32 %v132_v18, %v130_v20 }
  0xdb   :  { %136 = vst.msk [vmem:[%s234_s4] sm:$0xff] %vm21_vm0, %v134_v21 }

// kernel: compressive_transformer_forward.14
= control target key start
LH: loop header
LB: loop body
LE: loop exit
PB: predicated region body
PF: predicated region fallthrough
CT: control target
= control target key end

     0   :  { %s1056_s18 = smov 0   ;;  %s1058_s19 = smov 0   ;;  %s1192_s0 = inlined_call_operand.vmem [shape: f32[16,32], index: 0, kind: input, shape index: {}]   ;;  %s1193_s1 = inlined_call_operand.vmem [shape: f32[32,2048], index: 1, kind: input, shape index: {}]   ;;  %s1194_s2 = inlined_call_operand.vmem [shape: f32[1,2048], index: 2, kind: input, shape index: {}]   ;;  %s1195_s3 = inlined_call_operand.vmem [shape: f32[1,32], index: 3, kind: input, shape index: {}]   ;;  %s1196_s4 = inlined_call_operand.vmem [shape: f32[1,32], index: 4, kind: input, shape index: {}]   ;;  %s1197_s5 = inlined_call_operand.vmem [shape: f32[16,2048], index: 5, kind: output, shape index: {}]  }
   0x1   :  { %s1060_s20 = smov 0   ;;  %s1062_s21 = smov 0  }
   0x2   :  { %s1064_s22 = smov 0  }
   0x3 LB: > { %s30_s23 = sadd.s32 1, %s1019_s21  ;;  %s897_s24 = sadd.s32 4294967295, %s1023_s22   ;;  %s1023_s22 = sphi %s1064_s22, %s15_s22   ;;  %s1019_s21 = sphi %s1062_s21, %s1202_s21   ;;  %s1015_s20 = sphi %s1060_s20, %s1201_s20   ;;  %s1011_s19 = sphi %s1058_s19, %s1200_s19   ;;  %s1007_s18 = sphi %s1056_s18, %s1199_s18  }
   0x4   : > { %p32_p0 = scmp.ge.s32.totalorder %s30_s23, 4  ;;  %p78_p1 = scmp.ne.s32.totalorder %s1011_s19, %s1007_s18 }
   0x5   : > { %p79_p2 = scmp.eq.s32.totalorder %s1023_s22, 0  ;;  %p188_p4 = scmp.eq.s32.totalorder %s897_s24, 3 }
   0x6   : > { %s1204_s23 = smov (%p32_p0, %s30_s23), 0  ;;  %s71_s26 = sadd.s32 1, %s1011_s19 }
   0x7   : > { %p80_p3 = por %p79_p2, %p78_p1  ;;  %s67_s25 = ssub.s32 %s1019_s21, %s1204_s23 }
   0x8   : > { %p69_p5 = scmp.eq.s32.totalorder %s67_s25, 0  ;;  %p1091_p6 = por %p188_p4, %p78_p1 }
   0x9   : > { %p903_p7 = scmp.ge.s32.totalorder %s1023_s22, 4 }
   0xa   : > { %s1096_s28 = scalar_select %p69_p5, %s1011_s19, %s71_s26  }
   0xb   : > { %234 = sbr.rel (%p903_p7) target bundleno = 28 (0x1c), region = 28 }
  0x10   : > { %237 = sbr.rel (!%p80_p3) target bundleno = 28 (0x1c), region = 32  ;;  %s239_s29 = sand.u32 (%p80_p3), 1, %s1011_s19  }
  0x11   : > { %s922_s30 = sshll.u32 (%p80_p3), %s1019_s21, 5  ;;  %s904_s6 = sshll.u32 (%p80_p3), %s239_s29, 7 }
  0x12   : > { %s1104_s9 = scalar_lea.vmem (%p80_p3), %s1193_s1, %s922_s30  ;;  %s241_s10 = scalar_lea.vmem (%p80_p3), [#allocation3], %s904_s6 }
  0x13   : > { %v260_v0 = vld [vmem:[%s1104_s9] sm:$0xff] (%p80_p3)  ;;  %v262_v1 = vld [vmem:[%s1104_s9 + $0x8] sm:$0xff] (%p80_p3)  ;;  %v264_v2 = vld [vmem:[%s1104_s9 + $0x10] sm:$0xff] (%p80_p3) }
  0x14   : > { %261 = vst [vmem:[%s241_s10] sm:$0xff] (%p80_p3), %v260_v0  ;;  %263 = vst [vmem:[%s241_s10 + $0x8] sm:$0xff] (%p80_p3), %v262_v1  ;;  %v266_v3 = vld [vmem:[%s1104_s9 + $0x18] sm:$0xff] (%p80_p3)  ;;  %v268_v4 = vld [vmem:[%s1104_s9 + $0x80] sm:$0xff] (%p80_p3) }
  0x15   : > { %265 = vst [vmem:[%s241_s10 + $0x10] sm:$0xff] %v264_v2  ;;  %v270_v5 = vld [vmem:[%s1104_s9 + $0x88] sm:$0xff]  ;;  %267 = vst [vmem:[%s241_s10 + $0x18] sm:$0xff] %v266_v3  ;;  %v272_v6 = vld [vmem:[%s1104_s9 + $0x90] sm:$0xff] }
  0x16   : > { %269 = vst [vmem:[%s241_s10 + $0x20] sm:$0xff] %v268_v4  ;;  %271 = vst [vmem:[%s241_s10 + $0x28] sm:$0xff] %v270_v5  ;;  %v274_v7 = vld [vmem:[%s1104_s9 + $0x98] sm:$0xff]  ;;  %v276_v8 = vld [vmem:[%s1104_s9 + $0x100] sm:$0xff] }
  0x17   : > { %273 = vst [vmem:[%s241_s10 + $0x30] sm:$0xff] %v272_v6  ;;  %275 = vst [vmem:[%s241_s10 + $0x38] sm:$0xff] %v274_v7  ;;  %v278_v9 = vld [vmem:[%s1104_s9 + $0x108] sm:$0xff]  ;;  %v280_v10 = vld [vmem:[%s1104_s9 + $0x110] sm:$0xff] }
  0x18   : > { %277 = vst [vmem:[%s241_s10 + $0x40] sm:$0xff] %v276_v8  ;;  %v282_v11 = vld [vmem:[%s1104_s9 + $0x118] sm:$0xff]  ;;  %279 = vst [vmem:[%s241_s10 + $0x48] sm:$0xff] %v278_v9  ;;  %v284_v12 = vld [vmem:[%s1104_s9 + $0x180] sm:$0xff] }
  0x19   : > { %281 = vst [vmem:[%s241_s10 + $0x50] sm:$0xff] %v280_v10  ;;  %283 = vst [vmem:[%s241_s10 + $0x58] sm:$0xff] %v282_v11  ;;  %v286_v13 = vld [vmem:[%s1104_s9 + $0x188] sm:$0xff]  ;;  %v288_v14 = vld [vmem:[%s1104_s9 + $0x190] sm:$0xff] }
  0x1a   : > { %285 = vst [vmem:[%s241_s10 + $0x60] sm:$0xff] %v284_v12  ;;  %287 = vst [vmem:[%s241_s10 + $0x68] sm:$0xff] %v286_v13  ;;  %v290_v15 = vld [vmem:[%s1104_s9 + $0x198] sm:$0xff] }
  0x1b   : > { %289 = vst [vmem:[%s241_s10 + $0x70] sm:$0xff] %v288_v14  ;;  %291 = vst [vmem:[%s241_s10 + $0x78] sm:$0xff] %v290_v15 }
  0x1c PF: > { %p907_p8 = scmp.ge.s32.totalorder %s1023_s22, 1  ;;  %p304_p9 = scmp.lt.s32.totalorder %s1023_s22, 5 }
  0x1e   : > { %p305_p10 = pnand %p907_p8, %p304_p9 }
  0x1f   : > { %s311_s15 = sand.u32 (!%p305_p10), 1, %s1007_s18   ;;  %s910_s30 = sshll.u32 (!%p305_p10), %s1015_s20, 2 }
  0x20   : > { %308 = sbr.rel (%p305_p10) target bundleno = 577 (0x241), region = 59  ;;  %s908_s16 = sshll.u32 (!%p305_p10), %s311_s15, 7 }
  0x21   : > { %s313_s17 = scalar_lea.vmem (!%p305_p10), [#allocation3], %s908_s16  ;;  %p367_p11 = scmp.lt.s32.totalorder (!%p305_p10), %s910_s30, 15 }
  0x22   : > { %s909_s9 = sshll.u32 (!%p305_p10), %s311_s15, 6 }
  0x23   : > { %s1153_s10 = scalar_lea.vmem (!%p305_p10), [#allocation4], %s909_s9 }
  0x25   : > { %v391_v16 = vld [vmem:[%s1192_s0] sm:$0xff]  ;;  %vm393_vm0 = vcmask 261120   ;;  %v392_v17 = vld [vmem:[%s1192_s0 + $0x8] sm:$0xff]  ;;  %v1025_v30 = vmov 0.0   ;;  %v462_v32 = vld [vmem:[%s313_s17 + $0x78] sm:$0xff]  ;;  %v652_v63 = vlaneseq  ;;  %s1206_s30 = smov (!%p367_p11, %s910_s30), 15 }
  0x26   : > { %v394_v18 = vsel %vm393_vm0, %v391_v16, 0.0  ;;  %v397_v19 = vsel %vm393_vm0, %v392_v17, 0.0  ;;  %533 = vmatprep.mubr.f32.mxu0 %v1025_v30  ;;  %610 = vmatprep.mubr.f32.mxu1 %v1025_v30  ;;  %v460_v31 = vld [vmem:[%s313_s17 + $0x68] sm:$0xff]  ;;  %v459_v33 = vld [vmem:[%s313_s17 + $0x60] sm:$0xff]  ;;  %v461_v34 = vld [vmem:[%s313_s17 + $0x70] sm:$0xff]  ;;  %s369_s8 = scalar_lea.vmem %s1194_s2, %s1206_s30  ;;  %s923_s18 = sshll.u32 (%p1091_p6), %s1015_s20, 5 }
  0x27   : > { %395 = vadd.xlane.f32.xlu0 %v394_v18  ;;  %493 = vmatprep.subr.mxu0 %v460_v31  ;;  %v456_v35 = vld [vmem:[%s313_s17 + $0x48] sm:$0xff]  ;;  %v458_v36 = vld [vmem:[%s313_s17 + $0x58] sm:$0xff]  ;;  %v455_v37 = vld [vmem:[%s313_s17 + $0x40] sm:$0xff]  ;;  %v653_v0 = vshrl.u32 %v652_v63, 7  ;;  %s740_s13 = scalar_lea.vmem (%p1091_p6), %s1197_s5, %s923_s18 }
  0x28   : > { %570 = vmatprep.subr.mxu1 %v462_v32  ;;  %494 = vmatpush1.msra.mxu0 %v459_v33  ;;  %v457_v38 = vld [vmem:[%s313_s17 + $0x50] sm:$0xff]  ;;  %v452_v39 = vld [vmem:[%s313_s17 + $0x28] sm:$0xff]  ;;  %v454_v40 = vld [vmem:[%s313_s17 + $0x38] sm:$0xff] }
  0x29   : > { %571 = vmatpush1.msra.mxu1 %v461_v34  ;;  %495 = vmatprep.subr.mxu0 %v456_v35  ;;  %v451_v41 = vld [vmem:[%s313_s17 + $0x20] sm:$0xff]  ;;  %v453_v42 = vld [vmem:[%s313_s17 + $0x30] sm:$0xff]  ;;  %v448_v43 = vld [vmem:[%s313_s17 + $0x8] sm:$0xff]  ;;  %v654_v1 = vsub.s32 0, %v653_v0  ;;  %v662_v2 = vsub.s32 2, %v653_v0  ;;  %v658_v4 = vsub.s32 1, %v653_v0 }
  0x2a   : > { %572 = vmatprep.subr.mxu1 %v458_v36  ;;  %496 = vmatpush1.msra.mxu0 %v455_v37  ;;  %v450_v44 = vld [vmem:[%s313_s17 + $0x18] sm:$0xff]  ;;  %v447_v45 = vld [vmem:[%s313_s17] sm:$0xff]  ;;  %v449_v46 = vld [vmem:[%s313_s17 + $0x10] sm:$0xff]  ;;  %v666_v5 = vsub.s32 3, %v653_v0 }
  0x2b   : > { %398 = vadd.xlane.f32.xlu0 %v397_v19  ;;  %573 = vmatpush1.msra.mxu1 %v457_v38  ;;  %v911_v54 = vld [vmem:[%s1195_s3] ss:$0 sm:$0xff] }
  0x2c   : > { %497 = vmatprep.subr.mxu0 %v452_v39  ;;  %574 = vmatprep.subr.mxu1 %v454_v40  ;;  %v912_v56 = vld [vmem:[%s1196_s4] ss:$0 sm:$0xff] }
  0x2d   : > { %498 = vmatpush1.msra.mxu0 %v451_v41  ;;  %575 = vmatpush1.msra.mxu1 %v453_v42  ;;  %v650_v3 = vld [vmem:[%s369_s8] sm:$0xf] }
  0x2e   : > { %499 = vmatprep.subr.mxu0 %v448_v43  ;;  %576 = vmatprep.subr.mxu1 %v450_v44  ;;  %v655_v6 = vrot.slane %v650_v3, %v654_v1  ;;  %v663_v7 = vrot.slane %v650_v3, %v662_v2  ;;  %v659_v10 = vrot.slane %v650_v3, %v658_v4 }
  0x2f   : > { %500 = vmatpush1.msra.mxu0 %v447_v45  ;;  %577 = vmatpush1.msra.mxu1 %v449_v46  ;;  %v667_v11 = vrot.slane %v650_v3, %v666_v5 }
  0xb0   : > { %v396_v20 = vpop.xlane.xlu0 %395 }
  0xb1   : > { %v401_v21 = vmul.f32 0.03125, %v396_v20 }
  0xb3   : > { %v403_v22 = vsub.f32 %v391_v16, %v401_v21 }
  0xb4   : > { %v399_v23 = vpop.xlane.xlu0 %398 }
  0xb5   : > { %v402_v24 = vmul.f32 0.03125, %v399_v23  ;;  %v405_v25 = vmul.f32 %v403_v22, %v403_v22 }
  0xb7   : > { %v404_v26 = vsub.f32 %v392_v17, %v402_v24  ;;  %v407_v27 = vsel %vm393_vm0, %v405_v25, 0.0 }
  0xb8   : > { %408 = vadd.xlane.f32.xlu1 %v407_v27 }
  0xb9   : > { %v406_v28 = vmul.f32 %v404_v26, %v404_v26 }
  0xbb   : > { %v410_v29 = vsel %vm393_vm0, %v406_v28, 0.0 }
  0xbc   : > { %411 = vadd.xlane.f32.xlu1 %v410_v29 }
 0x141   : > { %v409_v47 = vpop.xlane.xlu1 %408 }
 0x142   : > { %v413_v48 = vmul.f32 0.03125, %v409_v47 }
 0x144   : > { %v415_v49 = vadd.f32 1e-05, %v413_v48 }
 0x145   : > { %v412_v50 = vpop.xlane.xlu1 %411 }
 0x146   : > { %965 = vrsqrt.f32 %v415_v49  ;;  %v414_v51 = vmul.f32 0.03125, %v412_v50 }
 0x148   : > { %v416_v52 = vadd.f32 1e-05, %v414_v51 }
 0x14a   : > { %967 = vrsqrt.f32 %v416_v52 }
 0x153   : > { %v966_v53 = vpop.eup %965 }
 0x154   : > { %v419_v55 = vmul.f32 %v966_v53, %v403_v22 }
 0x156   : > { %v428_v57 = vmul.f32 %v911_v54, %v419_v55 }
 0x157   : > { %v968_v58 = vpop.eup %967 }
 0x158   : > { %v437_v59 = vadd.f32 %v912_v56, %v428_v57  ;;  %v420_v60 = vmul.f32 %v968_v58, %v404_v26 }
 0x15a   : > { %913 = vmatmul.mubr.msk.f32.vlgmr.msra.gmra.mxu0 %vm393_vm0, %v437_v59  ;;  %915 = vmatmul.mubr.msk.f32.vlgmr.msra.gmra.mxu1 %vm393_vm0, %v437_v59  ;;  %v429_v61 = vmul.f32 %v911_v54, %v420_v60 }
 0x15b   : > { %539 = vmatprep.mubr.f32.mxu0 %v1025_v30  ;;  %616 = vmatprep.mubr.f32.mxu1 %v1025_v30 }
 0x15c   : > { %v438_v62 = vadd.f32 %v912_v56, %v429_v61 }
 0x15e   : > { %914 = vmatmul.mubr.msk.f32.gmra.mxu0 %vm393_vm0, %v438_v62  ;;  %916 = vmatmul.mubr.msk.f32.gmra.mxu1 %vm393_vm0, %v438_v62 }
 0x21a   : > { %v535_v8 = vpop.f32.mrf.mxu0  ;;  %v612_v9 = vpop.f32.mrf.mxu1 }
 0x21b   : > { %v672_v12 = vadd.f32 %v655_v6, %v535_v8  ;;  %v674_v13 = vadd.f32 %v663_v7, %v612_v9 }
 0x21c   : > { %v537_v14 = vpop.f32.mrf.mxu0  ;;  %v614_v15 = vpop.f32.mrf.mxu1 }
 0x21d   : > { %v688_v16 = vmul.f32 0.70710677, %v672_v12  ;;  %v690_v17 = vmul.f32 0.70710677, %v674_v13  ;;  %v673_v18 = vadd.f32 %v659_v10, %v537_v14  ;;  %v675_v19 = vadd.f32 %v667_v11, %v614_v15 }
 0x21e   : > { %v541_v20 = vpop.f32.mrf.mxu0  ;;  %v618_v21 = vpop.f32.mrf.mxu1  ;;  %v680_v36 = vmul.f32 0.5, %v672_v12  ;;  %v682_v38 = vmul.f32 0.5, %v674_v13 }
 0x21f   : > { %969 = verf.f32 %v688_v16  ;;  %v676_v22 = vadd.f32 %v655_v6, %v541_v20  ;;  %v678_v23 = vadd.f32 %v663_v7, %v618_v21  ;;  %v689_v24 = vmul.f32 0.70710677, %v673_v18 }
 0x220   : > { %971 = verf.f32 %v690_v17  ;;  %v543_v25 = vpop.f32.mrf.mxu0  ;;  %v620_v26 = vpop.f32.mrf.mxu1  ;;  %v691_v27 = vmul.f32 0.70710677, %v675_v19  ;;  %v681_v44 = vmul.f32 0.5, %v673_v18  ;;  %v683_v47 = vmul.f32 0.5, %v675_v19 }
 0x221   : > { %v692_v28 = vmul.f32 0.70710677, %v676_v22  ;;  %973 = verf.f32 %v689_v24  ;;  %v694_v29 = vmul.f32 0.70710677, %v678_v23  ;;  %v677_v30 = vadd.f32 %v659_v10, %v543_v25 }
 0x222   : > { %v679_v31 = vadd.f32 %v667_v11, %v620_v26  ;;  %975 = verf.f32 %v691_v27  ;;  %v684_v51 = vmul.f32 0.5, %v676_v22  ;;  %v686_v55 = vmul.f32 0.5, %v678_v23 }
 0x223   : > { %977 = verf.f32 %v692_v28  ;;  %v693_v32 = vmul.f32 0.70710677, %v677_v30  ;;  %v685_v59 = vmul.f32 0.5, %v677_v30 }
 0x224   : > { %979 = verf.f32 %v694_v29  ;;  %v695_v33 = vmul.f32 0.70710677, %v679_v31  ;;  %v687_v62 = vmul.f32 0.5, %v679_v31 }
 0x225   : > { %981 = verf.f32 %v693_v32 }
 0x226   : > { %983 = verf.f32 %v695_v33 }
 0x22c   : > { %v970_v34 = vpop.eup %969 }
 0x22d   : > { %v972_v35 = vpop.eup %971  ;;  %v704_v37 = vadd.f32 1.0, %v970_v34 }
 0x22e   : > { %v706_v39 = vadd.f32 1.0, %v972_v35  ;;  %v974_v40 = vpop.eup %973 }
 0x22f   : > { %v712_v41 = vmul.f32 %v704_v37, %v680_v36  ;;  %v976_v42 = vpop.eup %975  ;;  %v705_v45 = vadd.f32 1.0, %v974_v40 }
 0x230   : > { %v714_v43 = vmul.f32 %v706_v39, %v682_v38  ;;  %v978_v46 = vpop.eup %977  ;;  %v707_v48 = vadd.f32 1.0, %v976_v42 }
 0x231   : > { %720 = vst [vmem:[%s1153_s10] sm:$0xff] %v712_v41  ;;  %v980_v49 = vpop.eup %979  ;;  %v713_v50 = vmul.f32 %v705_v45, %v681_v44  ;;  %v708_v52 = vadd.f32 1.0, %v978_v46 }
 0x232   : > { %722 = vst [vmem:[%s1153_s10 + $0x10] sm:$0xff] %v714_v43  ;;  %v982_v53 = vpop.eup %981  ;;  %v715_v54 = vmul.f32 %v707_v48, %v683_v47  ;;  %v710_v56 = vadd.f32 1.0, %v980_v49 }
 0x233   : > { %v984_v57 = vpop.eup %983  ;;  %721 = vst [vmem:[%s1153_s10 + $0x8] sm:$0xff] %v713_v50  ;;  %v716_v58 = vmul.f32 %v708_v52, %v684_v51  ;;  %v709_v60 = vadd.f32 1.0, %v982_v53 }
 0x234   : > { %723 = vst [vmem:[%s1153_s10 + $0x18] sm:$0xff] %v715_v54  ;;  %v718_v61 = vmul.f32 %v710_v56, %v686_v55  ;;  %v711_v63 = vadd.f32 1.0, %v984_v57  ;;  %734 = sbr.rel (!%p1091_p6) target bundleno = 577 (0x241), region = 75 }
 0x235   : > { %724 = vst [vmem:[%s1153_s10 + $0x20] sm:$0xff] %v716_v58  ;;  %v717_v0 = vmul.f32 %v709_v60, %v685_v59 }
 0x236   : > { %726 = vst [vmem:[%s1153_s10 + $0x30] sm:$0xff] %v718_v61  ;;  %v719_v1 = vmul.f32 %v711_v63, %v687_v62 }
 0x237   : > { %725 = vst [vmem:[%s1153_s10 + $0x28] sm:$0xff] %v717_v0 }
 0x238   : > { %727 = vst [vmem:[%s1153_s10 + $0x38] sm:$0xff] %v719_v1  ;;  %v753_v2 = vld [vmem:[%s1153_s10] sm:$0xff] (%p1091_p6) }
 0x239   : > { %v757_v4 = vld [vmem:[%s1153_s10 + $0x10] sm:$0xff]  ;;  %754 = vst [vmem:[%s740_s13] sm:$0xff] %v753_v2 }
 0x23a   : > { %v755_v3 = vld [vmem:[%s1153_s10 + $0x8] sm:$0xff]  ;;  %758 = vst [vmem:[%s740_s13 + $0x10] sm:$0xff] %v757_v4 }
 0x23b   : > { %v759_v5 = vld [vmem:[%s1153_s10 + $0x18] sm:$0xff]  ;;  %756 = vst [vmem:[%s740_s13 + $0x8] sm:$0xff] %v755_v3 }
 0x23c   : > { %v761_v6 = vld [vmem:[%s1153_s10 + $0x20] sm:$0xff]  ;;  %760 = vst [vmem:[%s740_s13 + $0x18] sm:$0xff] %v759_v5 }
 0x23d   : > { %762 = vst [vmem:[%s740_s13 + $0x80] sm:$0xff] %v761_v6  ;;  %v765_v8 = vld [vmem:[%s1153_s10 + $0x30] sm:$0xff] }
 0x23e   : > { %v763_v7 = vld [vmem:[%s1153_s10 + $0x28] sm:$0xff]  ;;  %766 = vst [vmem:[%s740_s13 + $0x90] sm:$0xff] %v765_v8 }
 0x23f   : > { %764 = vst [vmem:[%s740_s13 + $0x88] sm:$0xff] %v763_v7  ;;  %v767_v9 = vld [vmem:[%s1153_s10 + $0x38] sm:$0xff] }
 0x240   : > { %768 = vst [vmem:[%s740_s13 + $0x98] sm:$0xff] %v767_v9 }
 0x241 PF: > { %s15_s22 = sadd.s32 1, %s1023_s22   ;;  %s1199_s18 = smov %s1011_s19 }
 0x242   : > { %p12_p12 = scmp.ge.s32.totalorder %s15_s22, 6   ;;  %s1200_s19 = smov %s1096_s28 }
 0x243   : > { %s1201_s20 = smov %s1019_s21  ;;  %s1202_s21 = smov %s1204_s23 }
 0x244   :  { %14 = sbr.rel (!%p12_p12) target bundleno = 3 (0x3), region = 141 }

// kernel: compressive_transformer_forward.12
= control target key start
LH: loop header
LB: loop body
LE: loop exit
PB: predicated region body
PF: predicated region fallthrough
CT: control target
= control target key end

     0   :  { %s1485_s15 = smov 0   ;;  %s1487_s16 = smov 0   ;;  %s1649_s0 = inlined_call_operand.vmem [shape: f32[2,8,32], index: 0, kind: input, shape index: {}]   ;;  %s1650_s1 = inlined_call_operand.vmem [shape: f32[2,8,32], index: 1, kind: input, shape index: {}]   ;;  %s1651_s2 = inlined_call_operand.vmem [shape: f32[2,8,32], index: 2, kind: input, shape index: {}]   ;;  %s1652_s3 = inlined_call_operand.vmem [shape: f32[4,8,8], index: 3, kind: input, shape index: {}]   ;;  %s1653_s4 = inlined_call_operand.vmem [shape: f32[2,8,32], index: 4, kind: output, shape index: {}]  }
   0x1   :  { %s1489_s17 = smov 0  }
   0x2 LB: > { %s33_s18 = sadd.s32 1, %s1444_s16  ;;  %p1288_p0 = scmp.ge.s32.totalorder %s1448_s17, 1  ;;  %s1448_s17 = sphi %s1489_s17, %s14_s17   ;;  %s1444_s16 = sphi %s1487_s16, %s1655_s16   ;;  %s1440_s15 = sphi %s1485_s15, %s1654_s15  }
   0x3   : > { %p35_p1 = scmp.ge.s32.totalorder %s33_s18, 2  ;;  %p229_p2 = scmp.lt.s32.totalorder %s1448_s17, 3 }
   0x5   : > { %s1657_s18 = smov (%p35_p1, %s33_s18), 0  ;;  %p230_p3 = pnand %p1288_p0, %p229_p2 }
   0x6   : > { %p280_p4 = scmp.lt.s32.totalorder (!%p230_p3), %s1440_s15, 1  ;;  %s1454_s28 = smov (!%p230_p3), 120  }
   0x7   : > { %233 = sbr.rel (%p230_p3) target bundleno = 1393 (0x571), region = 36  ;;  %s1455_s29 = smov (!%p230_p3), 112  }
   0x8   : > { %s1456_s30 = smov (!%p230_p3), 104   ;;  %s1457_s14 = smov (!%p230_p3), 8  }
   0x9   : > { %s1459_s20 = smov (!%p230_p3), 24  }
   0xc   : > { %vm328_vm0 = vcmask 64512   ;;  %v1450_v0 = vmov 0.0   ;;  %vm1451_vm1 = vmmov 0   ;;  %s1659_s15 = smov (!%p280_p4, %s1440_s15), 1  ;;  %vm319_vm2 = vcmask 7168   ;;  %v337_v5 = vld [vmem:[%s1652_s3] sm:$0xff] }
   0xd   : > { %1326 = vmatprep.subr.mxu0 %v1450_v0  ;;  %329 = vst.msk [vmem:[#allocation4] sm:$0xff] %vm328_vm0, %v1450_v0  ;;  %330 = vst.msk [vmem:[#allocation4 + $0x8] sm:$0xff] %vm328_vm0, %v1450_v0  ;;  %1328 = vmatprep.mubr.msk.f32.mxu0 %vm1451_vm1, %v1450_v0  ;;  %s1517_s19 = sshll.u32 %s1659_s15, 3  ;;  %v1452_v4 = vmov -inf   ;;  %v1453_v10 = vmov 0   ;;  %v1296_v28 = vld [vmem:[%s1652_s3 + $0x8] sm:$0xff] }
   0xe   : > { %331 = vst.msk [vmem:[#allocation4 + $0x10] sm:$0xff] %vm328_vm0, %v1450_v0  ;;  %332 = vst.msk [vmem:[#allocation4 + $0x18] sm:$0xff] %vm328_vm0, %v1450_v0  ;;  %1331 = vmatprep.subr.mxu1 %v1450_v0  ;;  %1333 = vmatprep.mubr.msk.f32.mxu1 %vm1451_vm1, %v1450_v0  ;;  %s293_s22 = scalar_lea.vmem %s1650_s1, %s1517_s19  ;;  %s286_s25 = scalar_lea.vmem %s1649_s0, %s1517_s19  ;;  %v1300_v32 = vld [vmem:[%s1652_s3 + $0x10] sm:$0xff]  ;;  %v1304_v37 = vld [vmem:[%s1652_s3 + $0x18] sm:$0xff]  ;;  %vm1151_vm3 = vcmask 130048   ;;  %vm1153_vm4 = vcmask 195584  }
   0xf   : > { %v334_v1 = vld [vmem:[%s293_s22] sm:$0xff]  ;;  %320 = vst.msk [vmem:[#allocation2] sm:$0xff] %vm319_vm2, %v1452_v4  ;;  %321 = vst.msk [vmem:[#allocation2 + $0x8] sm:$0xff] %vm319_vm2, %v1452_v4  ;;  %1400 = vset.pattern.permute.xlu0 %v1453_v10  ;;  %1401 = vset.pattern.permute.xlu1 %v1453_v10  ;;  %s300_s7 = scalar_lea.vmem %s1651_s2, %s1517_s19  ;;  %s1458_s15 = smov 16   ;;  %vm1155_vm5 = vcmask 261120  }
  0x10   : > { %v333_v2 = vld [vmem:[%s286_s25] sm:$0xff]  ;;  %1327 = vmatpush3.xpose.msk.msra.mxu0 %vm328_vm0, %v334_v1  ;;  %322 = vst.msk [vmem:[#allocation2 + $0x10] sm:$0xff] %vm319_vm2, %v1452_v4  ;;  %323 = vst.msk [vmem:[#allocation2 + $0x18] sm:$0xff] %vm319_vm2, %v1452_v4  ;;  %526 = vrot.lane.b32.xlu1 %v334_v1, %s1454_s28  ;;  %s314_s23 = scalar_lea.vmem %s1653_s4, %s1517_s19 }
  0x11   : > { %v336_v3 = vmul.f32 0.35355338, %v333_v2  ;;  %1341 = vmatprep.subr.mxu0 %v1450_v0  ;;  %324 = vst.msk [vmem:[#allocation3] sm:$0xff] %vm319_vm2, %v1450_v0  ;;  %325 = vst.msk [vmem:[#allocation3 + $0x8] sm:$0xff] %vm319_vm2, %v1450_v0  ;;  %v1568_v15 = vld [vmem:[%s300_s7] sm:$0xff] }
  0x12   : > { %326 = vst.msk [vmem:[#allocation3 + $0x10] sm:$0xff] %vm319_vm2, %v1450_v0  ;;  %327 = vst.msk [vmem:[#allocation3 + $0x18] sm:$0xff] %vm319_vm2, %v1450_v0  ;;  %1332 = vmatpush3.msra.mxu1 %v1568_v15 }
  0x13   : > { %1329 = vmatmul.mubr.msk.f32.vlgmr.msra.gmra.mxu0 %vm328_vm0, %v336_v3  ;;  %1336 = vmatprep.subr.mxu1 %v1450_v0 }
  0x14   : > { %1343 = vmatprep.mubr.msk.f32.mxu0 %vm1451_vm1, %v1450_v0  ;;  %524 = vrot.lane.b32.xlu1 %v336_v3, %s1454_s28 }
  0x16   : > { %v1554_v11 = vld [vmem:[#allocation2] sm:$0xff]  ;;  %v603_v43 = vld [vmem:[#allocation2 + $0x8] sm:$0xff] }
  0x17   : > { %v796_v46 = vld [vmem:[#allocation2 + $0x10] sm:$0xff]  ;;  %v988_v50 = vld [vmem:[#allocation2 + $0x18] sm:$0xff] }
  0x18   : > { %719 = vrot.lane.b32.xlu1 %v334_v1, %s1455_s29 }
  0x1c   : > { %717 = vrot.lane.b32.xlu1 %v336_v3, %s1455_s29 }
  0x20   : > { %911 = vrot.lane.b32.xlu1 %v334_v1, %s1456_s30 }
  0x24   : > { %909 = vrot.lane.b32.xlu1 %v336_v3, %s1456_s30 }
  0x82   : > { %v527_v16 = vpop.permute.xlu1 %526 }
  0x86   : > { %v525_v20 = vpop.permute.xlu1 %524 }
  0x8a   : > { %v720_v21 = vpop.permute.xlu1 %719 }
  0x8e   : > { %v718_v22 = vpop.permute.xlu1 %717 }
  0x92   : > { %v912_v24 = vpop.permute.xlu1 %911 }
  0x96   : > { %v910_v25 = vpop.permute.xlu1 %909 }
  0xd3   : > { %v411_v6 = vpop.f32.mrf.mxu0 }
  0xd4   : > { %v412_v7 = vadd.f32 %v411_v6, %v337_v5 }
  0xd5   : > { %v1330_v8 = vpop.f32.mrf.mxu0 }
  0xd6   : > { %v416_v9 = vsel %vm328_vm0, %v412_v7, -inf }
  0xd7   : > { %417 = vmax.xlane.f32.xlu0 %v416_v9 }
 0x160   : > { %v418_v12 = vpop.xlane.xlu0 %417 }
 0x161   : > { %v1557_v13 = vmax.f32 %v1554_v11, %v418_v12 }
 0x163   : > { %v420_v14 = vsub.f32 %v1554_v11, %v1557_v13  ;;  %521 = vst.msk [vmem:[#allocation2] sm:$0xff] %vm319_vm2, %v1557_v13  ;;  %425 = vperm.xlu0 %1400, %v1557_v13   ;;  %v620_v13 = vld [vmem:[#allocation3 + $0x8] sm:$0xff] }
 0x1de   : > { %v426_v17 = vpop.permute.xlu0 %425 }
 0x1df   : > { %v428_v18 = vsub.f32 %v412_v7, %v426_v17 }
 0x1e1   : > { %v429_v19 = vmul.f32 1.442695, %v428_v18 }
 0x1e3   : > { %1402 = vpow2.f32 %v429_v19 }
 0x1f0   : > { %v1403_v23 = vpop.eup %1402 }
 0x1f1   : > { %1334 = vmatmul.mubr.msk.f32.vlgmr.msra.gmra.mxu1 %vm328_vm0, %v1403_v23  ;;  %v433_v55 = vsel %vm328_vm0, %v1403_v23, 0.0 }
 0x1f2   : > { %1337 = vmatpush3.xpose.msk.msra.mxu1 %vm328_vm0, %v527_v16  ;;  %1338 = vmatprep.mubr.msk.f32.mxu1 %vm1451_vm1, %v1450_v0  ;;  %v421_v16 = vmul.f32 1.442695, %v420_v14 }
 0x1f3   : > { %1346 = vmatprep.subr.mxu1 %v1450_v0 }
 0x1f5   : > { %1339 = vmatmul.mubr.msk.f32.vlgmr.msra.gmra.mxu1 %vm328_vm0, %v525_v20 }
 0x1f6   : > { %1347 = vmatpush3.xpose.msk.msra.mxu1 %vm328_vm0, %v720_v21  ;;  %1348 = vmatprep.mubr.msk.f32.mxu1 %vm1451_vm1, %v1450_v0  ;;  %v431_v21 = vld [vmem:[#allocation3] sm:$0xff] }
 0x1f7   : > { %1356 = vmatprep.subr.mxu1 %v1450_v0 }
 0x1f9   : > { %1349 = vmatmul.mubr.msk.f32.vlgmr.msra.gmra.mxu1 %vm328_vm0, %v718_v22 }
 0x1fa   : > { %1357 = vmatpush3.xpose.msk.msra.mxu1 %vm328_vm0, %v912_v24  ;;  %1358 = vmatprep.mubr.msk.f32.mxu1 %vm1451_vm1, %v1450_v0 }
 0x1fd   : > { %1359 = vmatmul.mubr.msk.f32.vlgmr.msra.gmra.mxu1 %vm328_vm0, %v910_v25 }
 0x2b1   : > { %v1587_v26 = vpop.f32.mrf.mxu1 }
 0x2b3   : > { %v1335_v27 = vpop.f32.mrf.mxu1 }
 0x2b5   : > { %v598_v29 = vpop.f32.mrf.mxu1 }
 0x2b6   : > { %v599_v30 = vadd.f32 %v1296_v28, %v598_v29  ;;  %v813_v28 = vld [vmem:[#allocation3 + $0x10] sm:$0xff] }
 0x2b7   : > { %v1340_v31 = vpop.f32.mrf.mxu1 }
 0x2b8   : > { %v604_v33 = vsel %vm328_vm0, %v599_v30, -inf }
 0x2b9   : > { %605 = vmax.xlane.f32.xlu1 %v604_v33  ;;  %v791_v34 = vpop.f32.mrf.mxu1 }
 0x2ba   : > { %v792_v35 = vadd.f32 %v1300_v32, %v791_v34  ;;  %v1005_v32 = vld [vmem:[#allocation3 + $0x18] sm:$0xff] }
 0x2bb   : > { %v1350_v36 = vpop.f32.mrf.mxu1 }
 0x2bc   : > { %v797_v38 = vsel %vm328_vm0, %v792_v35, -inf }
 0x2bd   : > { %798 = vmax.xlane.f32.xlu0 %v797_v38  ;;  %v983_v39 = vpop.f32.mrf.mxu1  ;;  %v439_v38 = vld [vmem:[#allocation4] sm:$0xff] }
 0x2be   : > { %v984_v40 = vadd.f32 %v1304_v37, %v983_v39 }
 0x2bf   : > { %v1360_v41 = vpop.f32.mrf.mxu1 }
 0x2c0   : > { %v989_v42 = vsel %vm328_vm0, %v984_v40, -inf }
 0x2c1   : > { %990 = vmax.xlane.f32.xlu1 %v989_v42 }
 0x342   : > { %v606_v44 = vpop.xlane.xlu1 %605 }
 0x343   : > { %v607_v45 = vmax.f32 %v603_v43, %v606_v44 }
 0x345   : > { %v608_v47 = vsub.f32 %v603_v43, %v607_v45  ;;  %714 = vst.msk [vmem:[#allocation2 + $0x8] sm:$0xff] %vm319_vm2, %v607_v45  ;;  %613 = vperm.xlu1 %1401, %v607_v45  }
 0x346   : > { %v799_v48 = vpop.xlane.xlu0 %798 }
 0x347   : > { %v800_v49 = vmax.f32 %v796_v46, %v799_v48  ;;  %v609_v8 = vmul.f32 1.442695, %v608_v47  ;;  %v628_v47 = vld [vmem:[#allocation4 + $0x8] sm:$0xff] }
 0x349   : > { %v801_v51 = vsub.f32 %v796_v46, %v800_v49  ;;  %906 = vst.msk [vmem:[#allocation2 + $0x10] sm:$0xff] %vm319_vm2, %v800_v49  ;;  %806 = vperm.xlu0 %1400, %v800_v49  }
 0x34a   : > { %v991_v52 = vpop.xlane.xlu1 %990 }
 0x34b   : > { %v992_v53 = vmax.f32 %v988_v50, %v991_v52  ;;  %v802_v17 = vmul.f32 1.442695, %v801_v51 }
 0x34d   : > { %v993_v54 = vsub.f32 %v988_v50, %v992_v53  ;;  %1098 = vst.msk [vmem:[#allocation2 + $0x18] sm:$0xff] %vm319_vm2, %v992_v53  ;;  %998 = vperm.xlu1 %1401, %v992_v53   ;;  %v821_v50 = vld [vmem:[#allocation4 + $0x10] sm:$0xff] }
 0x34f   : > { %v994_v12 = vmul.f32 1.442695, %v993_v54 }
 0x351   : > { %636 = vrot.lane.b32.xlu1 %v1568_v15, %s1454_s28 }
 0x355   : > { %828 = vrot.lane.b32.xlu1 %v1568_v15, %s1455_s29 }
 0x359   : > { %1020 = vrot.lane.b32.xlu1 %v1568_v15, %s1456_s30 }
 0x37d   : > { %434 = vadd.xlane.f32.xlu1 %v433_v55 }
 0x3c0   : > { %v614_v56 = vpop.permute.xlu1 %613 }
 0x3c1   : > { %v616_v57 = vsub.f32 %v599_v30, %v614_v56 }
 0x3c3   : > { %v617_v58 = vmul.f32 1.442695, %v616_v57 }
 0x3c4   : > { %v807_v59 = vpop.permute.xlu0 %806 }
 0x3c5   : > { %1404 = vpow2.f32 %v617_v58  ;;  %v809_v60 = vsub.f32 %v792_v35, %v807_v59 }
 0x3c7   : > { %v810_v61 = vmul.f32 1.442695, %v809_v60 }
 0x3c8   : > { %v999_v62 = vpop.permute.xlu1 %998 }
 0x3c9   : > { %1406 = vpow2.f32 %v810_v61  ;;  %v1001_v63 = vsub.f32 %v984_v40, %v999_v62 }
 0x3cb   : > { %v1002_v1 = vmul.f32 1.442695, %v1001_v63 }
 0x3cc   : > { %v637_v2 = vpop.permute.xlu1 %636 }
 0x3cd   : > { %1408 = vpow2.f32 %v1002_v1  ;;  %1342 = vmatpush3.msra.mxu0 %v637_v2 }
 0x3ce   : > { %1351 = vmatprep.subr.mxu0 %v1450_v0  ;;  %1410 = vpow2.f32 %v609_v8 }
 0x3cf   : > { %1412 = vpow2.f32 %v994_v12 }
 0x3d0   : > { %v829_v3 = vpop.permute.xlu1 %828  ;;  %1414 = vpow2.f32 %v421_v16 }
 0x3d1   : > { %1416 = vpow2.f32 %v802_v17 }
 0x3d2   : > { %v1405_v4 = vpop.eup %1404 }
 0x3d3   : > { %1344 = vmatmul.mubr.msk.f32.vlgmr.msra.gmra.mxu0 %vm328_vm0, %v1405_v4  ;;  %v622_v5 = vsel %vm328_vm0, %v1405_v4, 0.0 }
 0x3d4   : > { %623 = vadd.xlane.f32.xlu0 %v622_v5  ;;  %1352 = vmatpush3.msra.mxu0 %v829_v3  ;;  %v1021_v6 = vpop.permute.xlu1 %1020 }
 0x3d5   : > { %1353 = vmatprep.mubr.msk.f32.mxu0 %vm1451_vm1, %v1450_v0  ;;  %1361 = vmatprep.subr.mxu0 %v1450_v0 }
 0x3d6   : > { %v1407_v7 = vpop.eup %1406 }
 0x3d7   : > { %1354 = vmatmul.mubr.msk.f32.vlgmr.msra.gmra.mxu0 %vm328_vm0, %v1407_v7  ;;  %v815_v9 = vsel %vm328_vm0, %v1407_v7, 0.0 }
 0x3d8   : > { %816 = vadd.xlane.f32.xlu1 %v815_v9  ;;  %1362 = vmatpush3.msra.mxu0 %v1021_v6 }
 0x3d9   : > { %1363 = vmatprep.mubr.msk.f32.mxu0 %vm1451_vm1, %v1450_v0 }
 0x3da   : > { %v1409_v10 = vpop.eup %1408 }
 0x3db   : > { %1364 = vmatmul.mubr.msk.f32.vlgmr.msra.gmra.mxu0 %vm328_vm0, %v1409_v10  ;;  %v1007_v15 = vsel %vm328_vm0, %v1409_v10, 0.0  ;;  %v1411_v18 = vpop.eup %1410 }
 0x3dc   : > { %1008 = vadd.xlane.f32.xlu0 %v1007_v15  ;;  %v1413_v19 = vpop.eup %1412  ;;  %v621_v14 = vmul.f32 %v1411_v18, %v620_v13 }
 0x3dd   : > { %v1415_v0 = vpop.eup %1414  ;;  %v1006_v34 = vmul.f32 %v1413_v19, %v1005_v32 }
 0x3de   : > { %v1417_v20 = vpop.eup %1416  ;;  %v432_v22 = vmul.f32 %v1415_v0, %v431_v21 }
 0x3df   : > { %v814_v30 = vmul.f32 %v1417_v20, %v813_v28 }
 0x3e9   : > { %631 = vperm.xlu1 %1401, %v1411_v18  }
 0x3ed   : > { %1016 = vperm.xlu1 %1401, %v1413_v19  }
 0x3f2   : > { %442 = vperm.xlu0 %1400, %v1415_v0  }
 0x3f6   : > { %824 = vperm.xlu0 %1400, %v1417_v20  }
 0x406   : > { %v435_v23 = vpop.xlane.xlu1 %434 }
 0x407   : > { %v436_v24 = vadd.f32 %v435_v23, %v432_v22 }
 0x409   : > { %438 = vst.msk [vmem:[#allocation3] sm:$0xff] %vm319_vm2, %v436_v24 }
 0x410   : > { %v1103_v25 = vld [vmem:[#allocation3] sm:$0xff] }
 0x411   : > { %1418 = vrcp.f32 %v1103_v25 }
 0x41e   : > { %v1419_v11 = vpop.eup %1418 }
 0x41f   : > { %1107 = vperm.xlu1 %1401, %v1419_v11  }
 0x45d   : > { %v624_v27 = vpop.xlane.xlu0 %623 }
 0x45e   : > { %v625_v29 = vadd.f32 %v624_v27, %v621_v14 }
 0x460   : > { %626 = vst.msk [vmem:[#allocation3 + $0x8] sm:$0xff] %vm319_vm2, %v625_v29 }
 0x461   : > { %v817_v31 = vpop.xlane.xlu1 %816 }
 0x462   : > { %v818_v33 = vadd.f32 %v817_v31, %v814_v30 }
 0x464   : > { %819 = vst.msk [vmem:[#allocation3 + $0x10] sm:$0xff] %vm319_vm2, %v818_v33 }
 0x465   : > { %v1009_v35 = vpop.xlane.xlu0 %1008  ;;  %v632_v48 = vpop.permute.xlu1 %631 }
 0x466   : > { %v1010_v36 = vadd.f32 %v1009_v35, %v1006_v34  ;;  %v634_v49 = vmul.f32 %v632_v48, %v628_v47 }
 0x467   : > { %v1112_v37 = vld [vmem:[#allocation3 + $0x8] sm:$0xff] }
 0x468   : > { %1011 = vst.msk [vmem:[#allocation3 + $0x18] sm:$0xff] %vm319_vm2, %v1010_v36  ;;  %1420 = vrcp.f32 %v1112_v37 }
 0x469   : > { %v1017_v56 = vpop.permute.xlu1 %1016 }
 0x46b   : > { %v1121_v39 = vld [vmem:[#allocation3 + $0x10] sm:$0xff] }
 0x46c   : > { %1422 = vrcp.f32 %v1121_v39 }
 0x46d   : > { %v443_v40 = vpop.permute.xlu0 %442 }
 0x46e   : > { %v445_v41 = vmul.f32 %v443_v40, %v439_v38 }
 0x46f   : > { %v1130_v42 = vld [vmem:[#allocation3 + $0x18] sm:$0xff] }
 0x470   : > { %v519_v43 = vadd.f32 %v1587_v26, %v445_v41  ;;  %1424 = vrcp.f32 %v1130_v42  ;;  %v1013_v26 = vld [vmem:[#allocation4 + $0x18] sm:$0xff] }
 0x471   : > { %v825_v51 = vpop.permute.xlu0 %824  ;;  %v1019_v60 = vmul.f32 %v1017_v56, %v1013_v26 }
 0x472   : > { %520 = vst.msk [vmem:[#allocation4] sm:$0xff] %vm328_vm0, %v519_v43  ;;  %v827_v55 = vmul.f32 %v825_v51, %v821_v50 }
 0x475   : > { %v1421_v44 = vpop.eup %1420 }
 0x476   : > { %1116 = vperm.xlu0 %1400, %v1421_v44  }
 0x479   : > { %v1423_v45 = vpop.eup %1422  ;;  %v1102_v12 = vld [vmem:[#allocation4] sm:$0xff] }
 0x47a   : > { %1125 = vperm.xlu1 %1401, %v1423_v45  }
 0x47d   : > { %v1425_v46 = vpop.eup %1424 }
 0x47e   : > { %1134 = vperm.xlu0 %1400, %v1425_v46  }
 0x493   : > { %v708_v52 = vpop.f32.mrf.mxu0 }
 0x494   : > { %v712_v53 = vadd.f32 %v708_v52, %v634_v49 }
 0x495   : > { %v1345_v54 = vpop.f32.mrf.mxu0 }
 0x496   : > { %713 = vst.msk [vmem:[#allocation4 + $0x8] sm:$0xff] %vm328_vm0, %v712_v53 }
 0x497   : > { %v900_v57 = vpop.f32.mrf.mxu0 }
 0x498   : > { %v904_v58 = vadd.f32 %v900_v57, %v827_v55 }
 0x499   : > { %v1355_v59 = vpop.f32.mrf.mxu0 }
 0x49a   : > { %905 = vst.msk [vmem:[#allocation4 + $0x10] sm:$0xff] %vm328_vm0, %v904_v58  ;;  %v1108_v1 = vpop.permute.xlu1 %1107 }
 0x49b   : > { %v1092_v61 = vpop.f32.mrf.mxu0  ;;  %v1110_v16 = vmul.f32 %v1108_v1, %v1102_v12 }
 0x49c   : > { %v1096_v62 = vadd.f32 %v1092_v61, %v1019_v60 }
 0x49d   : > { %v1365_v63 = vpop.f32.mrf.mxu0  ;;  %v1111_v3 = vld [vmem:[#allocation4 + $0x8] sm:$0xff] }
 0x49e   : > { %1097 = vst.msk [vmem:[#allocation4 + $0x18] sm:$0xff] %vm328_vm0, %v1096_v62 }
 0x4a1   : > { %v1120_v6 = vld [vmem:[#allocation4 + $0x10] sm:$0xff] }
 0x4a5   : > { %v1129_v9 = vld [vmem:[#allocation4 + $0x18] sm:$0xff] }
 0x4f1   : > { %v1117_v2 = vpop.permute.xlu0 %1116 }
 0x4f2   : > { %v1119_v4 = vmul.f32 %v1117_v2, %v1111_v3 }
 0x4f4   : > { %1139 = vrot.lane.b32.xlu1 %v1119_v4, %s1457_s14 }
 0x4f5   : > { %v1126_v5 = vpop.permute.xlu1 %1125 }
 0x4f6   : > { %v1128_v7 = vmul.f32 %v1126_v5, %v1120_v6 }
 0x4f8   : > { %1143 = vrot.lane.b32.xlu0 %v1128_v7, %s1458_s15 }
 0x4f9   : > { %v1135_v8 = vpop.permute.xlu0 %1134 }
 0x4fa   : > { %v1137_v10 = vmul.f32 %v1135_v8, %v1129_v9 }
 0x4fc   : > { %1147 = vrot.lane.b32.xlu1 %v1137_v10, %s1459_s20 }
 0x566   : > { %v1140_v15 = vpop.permute.xlu1 %1139 }
 0x567   : > { %v1150_v18 = vsel %vm328_vm0, %v1110_v16, %v1140_v15 }
 0x56a   : > { %v1144_v17 = vpop.permute.xlu0 %1143 }
 0x56b   : > { %v1152_v19 = vsel %vm1151_vm3, %v1150_v18, %v1144_v17 }
 0x56e   : > { %v1148_v0 = vpop.permute.xlu1 %1147 }
 0x56f   : > { %v1154_v20 = vsel %vm1153_vm4, %v1152_v19, %v1148_v0 }
 0x570   : > { %1156 = vst.msk [vmem:[%s314_s23] sm:$0xff] %vm1155_vm5, %v1154_v20 }
 0x571 PF: > { %s14_s17 = sadd.s32 1, %s1448_s17   ;;  %s1654_s15 = smov %s1444_s16 }
 0x572   : > { %p11_p5 = scmp.ge.s32.totalorder %s14_s17, 4   ;;  %s1655_s16 = smov %s1657_s18 }
 0x574   :  { %13 = sbr.rel (!%p11_p5) target bundleno = 2 (0x2), region = 95 }

// kernel: compressive_transformer_forward.15
= control target key start
LH: loop header
LB: loop body
LE: loop exit
PB: predicated region body
PF: predicated region fallthrough
CT: control target
= control target key end

     0   :  { %s936_s15 = smov 0   ;;  %s938_s16 = smov 0   ;;  %s1098_s0 = inlined_call_operand.vmem [shape: f32[16,2048], index: 0, kind: input, shape index: {}]   ;;  %s1099_s1 = inlined_call_operand.vmem [shape: f32[2048,32], index: 1, kind: input, shape index: {}]   ;;  %s1100_s2 = inlined_call_operand.vmem [shape: f32[1,32], index: 2, kind: input, shape index: {}]   ;;  %s1101_s3 = inlined_call_operand.vmem [shape: f32[16,32], index: 3, kind: input, shape index: {}]   ;;  %s1102_s4 = inlined_call_operand.vmem [shape: f32[16,32], index: 4, kind: output, shape index: {}]  }
   0x1   :  { %s940_s17 = smov 0   ;;  %s942_s18 = smov 0  }
   0x2   :  { %s944_s19 = smov 0  }
   0x3 LB: > { %s26_s20 = sadd.s32 1, %s904_s18  ;;  %p49_p1 = scmp.ne.s32.totalorder %s896_s16, %s892_s15  ;;  %s908_s19 = sphi %s944_s19, %s14_s19   ;;  %s904_s18 = sphi %s942_s18, %s1106_s18   ;;  %s900_s17 = sphi %s940_s17, %s1105_s17   ;;  %s896_s16 = sphi %s938_s16, %s1104_s16   ;;  %s892_s15 = sphi %s936_s15, %s1103_s15  }
   0x4   : > { %p27_p0 = scmp.ge.s32.totalorder %s26_s20, 4  ;;  %p50_p2 = scmp.eq.s32.totalorder %s908_s19, 0 }
   0x5   : > { %s42_s22 = sadd.s32 1, %s896_s16  ;;  %p737_p5 = scmp.ge.s32.totalorder %s908_s19, 4 }
   0x6   : > { %s1108_s20 = smov (%p27_p0, %s26_s20), 0  ;;  %p51_p3 = por %p50_p2, %p49_p1 }
   0x7   : > { %s38_s21 = ssub.s32 %s904_s18, %s1108_s20  ;;  %203 = sbr.rel (%p737_p5) target bundleno = 20 (0x14), region = 24 }
   0x8   : > { %p40_p4 = scmp.eq.s32.totalorder %s38_s21, 0 }
   0xa   : > { %s971_s23 = scalar_select %p40_p4, %s896_s16, %s42_s22  }
   0xc   : > { %206 = sbr.rel (!%p51_p3) target bundleno = 20 (0x14), region = 28  ;;  %s208_s24 = sand.u32 (%p51_p3), 1, %s896_s16  }
   0xd   : > { %s752_s25 = sshll.u32 (%p51_p3), %s904_s18, 5  ;;  %s738_s26 = sshll.u32 (%p51_p3), %s208_s24, 6 }
   0xe   : > { %s216_s29 = scalar_lea.vmem (%p51_p3), %s1098_s0, %s752_s25  ;;  %s210_s30 = scalar_lea.vmem (%p51_p3), [#allocation3], %s738_s26 }
   0xf   : > { %v229_v0 = vld [vmem:[%s216_s29] sm:$0xff] (%p51_p3)  ;;  %v231_v1 = vld [vmem:[%s216_s29 + $0x8] sm:$0xff] (%p51_p3)  ;;  %v233_v2 = vld [vmem:[%s216_s29 + $0x10] sm:$0xff] (%p51_p3) }
  0x10   : > { %230 = vst [vmem:[%s210_s30] sm:$0xff] (%p51_p3), %v229_v0  ;;  %232 = vst [vmem:[%s210_s30 + $0x8] sm:$0xff] (%p51_p3), %v231_v1  ;;  %v235_v3 = vld [vmem:[%s216_s29 + $0x18] sm:$0xff] (%p51_p3)  ;;  %v237_v4 = vld [vmem:[%s216_s29 + $0x80] sm:$0xff] (%p51_p3) }
  0x11   : > { %234 = vst [vmem:[%s210_s30 + $0x10] sm:$0xff] %v233_v2  ;;  %v239_v5 = vld [vmem:[%s216_s29 + $0x88] sm:$0xff]  ;;  %236 = vst [vmem:[%s210_s30 + $0x18] sm:$0xff] %v235_v3  ;;  %v241_v6 = vld [vmem:[%s216_s29 + $0x90] sm:$0xff] }
  0x12   : > { %238 = vst [vmem:[%s210_s30 + $0x20] sm:$0xff] %v237_v4  ;;  %240 = vst [vmem:[%s210_s30 + $0x28] sm:$0xff] %v239_v5  ;;  %v243_v7 = vld [vmem:[%s216_s29 + $0x98] sm:$0xff] }
  0x13   : > { %242 = vst [vmem:[%s210_s30 + $0x30] sm:$0xff] %v241_v6  ;;  %244 = vst [vmem:[%s210_s30 + $0x38] sm:$0xff] %v243_v7 }
  0x14 PF: > { %p741_p6 = scmp.ge.s32.totalorder %s908_s19, 1  ;;  %p261_p7 = scmp.lt.s32.totalorder %s908_s19, 5 }
  0x16   : > { %p262_p8 = pnand %p741_p6, %p261_p7 }
  0x17   : > { %s268_s5 = sand.u32 (!%p262_p8), 1, %s892_s15   ;;  %s743_s6 = sshll.u32 (!%p262_p8), %s900_s17, 6 }
  0x18   : > { %265 = sbr.rel (%p262_p8) target bundleno = 290 (0x122), region = 55  ;;  %s742_s7 = sshll.u32 (!%p262_p8), %s268_s5, 6 }
  0x19   : > { %p318_p9 = scmp.lt.s32.totalorder (!%p262_p8), %s743_s6, 255  ;;  %s988_s12 = scalar_lea.vmem (!%p262_p8), [#allocation3], %s742_s7 }
  0x1a   : > { %p745_p10 = scmp.ne.s32.totalorder (!%p262_p8), %s900_s17, 0 }
  0x1d   : > { %s1110_s6 = smov (!%p318_p9, %s743_s6), 255  ;;  %350 = sbr.rel (%p745_p10) target bundleno = 36 (0x24), region = 63 }
  0x1e   : > { %s744_s8 = sshll.u32 %s1110_s6, 3 }
  0x1f   : > { %s986_s11 = scalar_lea.vmem %s1099_s1, %s744_s8 }
  0x22   : > { %vm351_vm0 = vcmask 261120   ;;  %v910_v8 = vmov 0.0  }
  0x23   : > { %352 = vst.msk [vmem:[#allocation2] sm:$0xff] %vm351_vm0, %v910_v8  ;;  %353 = vst.msk [vmem:[#allocation2 + $0x8] sm:$0xff] %vm351_vm0, %v910_v8 }
  0x24 PF: > { %v395_v9 = vld [vmem:[%s986_s11 + $0xf8] sm:$0xff]  ;;  %v394_v13 = vld [vmem:[%s986_s11 + $0xf0] sm:$0xff]  ;;  %v393_v17 = vld [vmem:[%s986_s11 + $0xe8] sm:$0xff]  ;;  %vm580_vm1 = vcmask 261120   ;;  %p746_p11 = scmp.ne.s32.totalorder %s900_s17, 3 }
  0x25   : > { %v427_v10 = vld [vmem:[%s986_s11 + $0x1f8] sm:$0xff]  ;;  %753 = vmatprep.subr.mxu0 %v395_v9  ;;  %v426_v14 = vld [vmem:[%s986_s11 + $0x1f0] sm:$0xff]  ;;  %v425_v18 = vld [vmem:[%s986_s11 + $0x1e8] sm:$0xff] }
  0x26   : > { %v379_v11 = vld [vmem:[%s986_s11 + $0x78] sm:$0xff]  ;;  %791 = vmatprep.subr.mxu1 %v427_v10  ;;  %v378_v15 = vld [vmem:[%s986_s11 + $0x70] sm:$0xff]  ;;  %v377_v19 = vld [vmem:[%s986_s11 + $0x68] sm:$0xff] }
  0x27   : > { %v411_v12 = vld [vmem:[%s986_s11 + $0x178] sm:$0xff]  ;;  %754 = vmatpush3.msra.mxu0 %v379_v11  ;;  %v410_v16 = vld [vmem:[%s986_s11 + $0x170] sm:$0xff]  ;;  %v409_v20 = vld [vmem:[%s986_s11 + $0x168] sm:$0xff] }
  0x28   : > { %792 = vmatpush3.msra.mxu1 %v411_v12  ;;  %755 = vmatprep.subr.mxu0 %v394_v13  ;;  %v392_v21 = vld [vmem:[%s986_s11 + $0xe0] sm:$0xff]  ;;  %v391_v25 = vld [vmem:[%s986_s11 + $0xd8] sm:$0xff]  ;;  %v390_v29 = vld [vmem:[%s986_s11 + $0xd0] sm:$0xff] }
  0x29   : > { %793 = vmatprep.subr.mxu1 %v426_v14  ;;  %756 = vmatpush3.msra.mxu0 %v378_v15  ;;  %v424_v22 = vld [vmem:[%s986_s11 + $0x1e0] sm:$0xff]  ;;  %v423_v26 = vld [vmem:[%s986_s11 + $0x1d8] sm:$0xff]  ;;  %v422_v30 = vld [vmem:[%s986_s11 + $0x1d0] sm:$0xff] }
  0x2a   : > { %794 = vmatpush3.msra.mxu1 %v410_v16  ;;  %757 = vmatprep.subr.mxu0 %v393_v17  ;;  %v376_v23 = vld [vmem:[%s986_s11 + $0x60] sm:$0xff]  ;;  %v375_v27 = vld [vmem:[%s986_s11 + $0x58] sm:$0xff]  ;;  %v374_v31 = vld [vmem:[%s986_s11 + $0x50] sm:$0xff] }
  0x2b   : > { %795 = vmatprep.subr.mxu1 %v425_v18  ;;  %v408_v24 = vld [vmem:[%s986_s11 + $0x160] sm:$0xff]  ;;  %758 = vmatpush3.msra.mxu0 %v377_v19  ;;  %v407_v28 = vld [vmem:[%s986_s11 + $0x158] sm:$0xff]  ;;  %v406_v32 = vld [vmem:[%s986_s11 + $0x150] sm:$0xff] }
  0x2c   : > { %796 = vmatpush3.msra.mxu1 %v409_v20  ;;  %759 = vmatprep.subr.mxu0 %v392_v21  ;;  %v389_v33 = vld [vmem:[%s986_s11 + $0xc8] sm:$0xff]  ;;  %v388_v37 = vld [vmem:[%s986_s11 + $0xc0] sm:$0xff]  ;;  %v387_v41 = vld [vmem:[%s986_s11 + $0xb8] sm:$0xff] }
  0x2d   : > { %797 = vmatprep.subr.mxu1 %v424_v22  ;;  %760 = vmatpush3.msra.mxu0 %v376_v23  ;;  %v421_v34 = vld [vmem:[%s986_s11 + $0x1c8] sm:$0xff]  ;;  %v420_v38 = vld [vmem:[%s986_s11 + $0x1c0] sm:$0xff]  ;;  %v419_v42 = vld [vmem:[%s986_s11 + $0x1b8] sm:$0xff] }
  0x2e   : > { %798 = vmatpush3.msra.mxu1 %v408_v24  ;;  %761 = vmatprep.subr.mxu0 %v391_v25  ;;  %v373_v35 = vld [vmem:[%s986_s11 + $0x48] sm:$0xff]  ;;  %v372_v39 = vld [vmem:[%s986_s11 + $0x40] sm:$0xff]  ;;  %v371_v43 = vld [vmem:[%s986_s11 + $0x38] sm:$0xff] }
  0x2f   : > { %799 = vmatprep.subr.mxu1 %v423_v26  ;;  %762 = vmatpush3.msra.mxu0 %v375_v27  ;;  %v405_v36 = vld [vmem:[%s986_s11 + $0x148] sm:$0xff]  ;;  %v404_v40 = vld [vmem:[%s986_s11 + $0x140] sm:$0xff]  ;;  %v403_v44 = vld [vmem:[%s986_s11 + $0x138] sm:$0xff] }
  0x30   : > { %800 = vmatpush3.msra.mxu1 %v407_v28  ;;  %763 = vmatprep.subr.mxu0 %v390_v29  ;;  %v386_v45 = vld [vmem:[%s986_s11 + $0xb0] sm:$0xff]  ;;  %v385_v49 = vld [vmem:[%s986_s11 + $0xa8] sm:$0xff]  ;;  %v384_v53 = vld [vmem:[%s986_s11 + $0xa0] sm:$0xff] }
  0x31   : > { %801 = vmatprep.subr.mxu1 %v422_v30  ;;  %764 = vmatpush3.msra.mxu0 %v374_v31  ;;  %v418_v46 = vld [vmem:[%s986_s11 + $0x1b0] sm:$0xff]  ;;  %v417_v50 = vld [vmem:[%s986_s11 + $0x1a8] sm:$0xff]  ;;  %v416_v54 = vld [vmem:[%s986_s11 + $0x1a0] sm:$0xff] }
  0x32   : > { %802 = vmatpush3.msra.mxu1 %v406_v32  ;;  %765 = vmatprep.subr.mxu0 %v389_v33  ;;  %v370_v47 = vld [vmem:[%s986_s11 + $0x30] sm:$0xff]  ;;  %v369_v51 = vld [vmem:[%s986_s11 + $0x28] sm:$0xff]  ;;  %v368_v55 = vld [vmem:[%s986_s11 + $0x20] sm:$0xff] }
  0x33   : > { %803 = vmatprep.subr.mxu1 %v421_v34  ;;  %766 = vmatpush3.msra.mxu0 %v373_v35  ;;  %v402_v48 = vld [vmem:[%s986_s11 + $0x130] sm:$0xff]  ;;  %v401_v52 = vld [vmem:[%s986_s11 + $0x128] sm:$0xff]  ;;  %v400_v56 = vld [vmem:[%s986_s11 + $0x120] sm:$0xff] }
  0x34   : > { %804 = vmatpush3.msra.mxu1 %v405_v36  ;;  %767 = vmatprep.subr.mxu0 %v388_v37  ;;  %v383_v57 = vld [vmem:[%s986_s11 + $0x98] sm:$0xff]  ;;  %v382_v61 = vld [vmem:[%s986_s11 + $0x90] sm:$0xff]  ;;  %v381_v1 = vld [vmem:[%s986_s11 + $0x88] sm:$0xff] }
  0x35   : > { %805 = vmatprep.subr.mxu1 %v420_v38  ;;  %768 = vmatpush3.msra.mxu0 %v372_v39  ;;  %v415_v58 = vld [vmem:[%s986_s11 + $0x198] sm:$0xff]  ;;  %v414_v62 = vld [vmem:[%s986_s11 + $0x190] sm:$0xff]  ;;  %v413_v2 = vld [vmem:[%s986_s11 + $0x188] sm:$0xff] }
  0x36   : > { %806 = vmatpush3.msra.mxu1 %v404_v40  ;;  %769 = vmatprep.subr.mxu0 %v387_v41  ;;  %v367_v59 = vld [vmem:[%s986_s11 + $0x18] sm:$0xff]  ;;  %v366_v63 = vld [vmem:[%s986_s11 + $0x10] sm:$0xff]  ;;  %v365_v3 = vld [vmem:[%s986_s11 + $0x8] sm:$0xff] }
  0x37   : > { %807 = vmatprep.subr.mxu1 %v419_v42  ;;  %770 = vmatpush3.msra.mxu0 %v371_v43  ;;  %v399_v60 = vld [vmem:[%s986_s11 + $0x118] sm:$0xff]  ;;  %v398_v0 = vld [vmem:[%s986_s11 + $0x110] sm:$0xff]  ;;  %v397_v4 = vld [vmem:[%s986_s11 + $0x108] sm:$0xff] }
  0x38   : > { %808 = vmatpush3.msra.mxu1 %v403_v44  ;;  %771 = vmatprep.subr.mxu0 %v386_v45  ;;  %v380_v5 = vld [vmem:[%s986_s11 + $0x80] sm:$0xff]  ;;  %v355_v8 = vld [vmem:[%s988_s12 + $0x8] sm:$0xff]  ;;  %v357_v10 = vld [vmem:[%s988_s12 + $0x18] sm:$0xff] }
  0x39   : > { %809 = vmatprep.subr.mxu1 %v418_v46  ;;  %772 = vmatpush3.msra.mxu0 %v370_v47  ;;  %v412_v6 = vld [vmem:[%s986_s11 + $0x180] sm:$0xff]  ;;  %v354_v11 = vld [vmem:[%s988_s12] sm:$0xff]  ;;  %v359_v13 = vld [vmem:[%s988_s12 + $0x28] sm:$0xff] }
  0x3a   : > { %810 = vmatpush3.msra.mxu1 %v402_v48  ;;  %773 = vmatprep.subr.mxu0 %v385_v49  ;;  %v364_v7 = vld [vmem:[%s986_s11] sm:$0xff]  ;;  %v361_v14 = vld [vmem:[%s988_s12 + $0x38] sm:$0xff]  ;;  %v358_v15 = vld [vmem:[%s988_s12 + $0x20] sm:$0xff] }
  0x3b   : > { %811 = vmatprep.subr.mxu1 %v417_v50  ;;  %774 = vmatpush3.msra.mxu0 %v369_v51  ;;  %v396_v9 = vld [vmem:[%s986_s11 + $0x100] sm:$0xff]  ;;  %v363_v32 = vld [vmem:[#allocation2 + $0x8] sm:$0xff] }
  0x3c   : > { %812 = vmatpush3.msra.mxu1 %v401_v52  ;;  %775 = vmatprep.subr.mxu0 %v384_v53  ;;  %v356_v12 = vld [vmem:[%s988_s12 + $0x10] sm:$0xff] }
  0x3d   : > { %813 = vmatprep.subr.mxu1 %v416_v54  ;;  %776 = vmatpush3.msra.mxu0 %v368_v55  ;;  %v360_v16 = vld [vmem:[%s988_s12 + $0x30] sm:$0xff] }
  0x3e   : > { %814 = vmatpush3.msra.mxu1 %v400_v56  ;;  %777 = vmatprep.subr.mxu0 %v383_v57  ;;  %v362_v23 = vld [vmem:[#allocation2] sm:$0xff] }
  0x3f   : > { %815 = vmatprep.subr.mxu1 %v415_v58  ;;  %778 = vmatpush3.msra.mxu0 %v367_v59 }
  0x40   : > { %816 = vmatpush3.msra.mxu1 %v399_v60  ;;  %779 = vmatprep.subr.mxu0 %v382_v61 }
  0x41   : > { %817 = vmatprep.subr.mxu1 %v414_v62  ;;  %780 = vmatpush3.msra.mxu0 %v366_v63 }
  0x42   : > { %818 = vmatpush3.msra.mxu1 %v398_v0  ;;  %781 = vmatprep.subr.mxu0 %v381_v1 }
  0x43   : > { %819 = vmatprep.subr.mxu1 %v413_v2  ;;  %782 = vmatpush3.msra.mxu0 %v365_v3 }
  0x44   : > { %820 = vmatpush3.msra.mxu1 %v397_v4  ;;  %783 = vmatprep.subr.mxu0 %v380_v5 }
  0x45   : > { %821 = vmatprep.subr.mxu1 %v412_v6  ;;  %784 = vmatpush3.msra.mxu0 %v364_v7 }
  0x46   : > { %492 = vmatprep.mubr.f32.mxu0 %v355_v8  ;;  %822 = vmatpush3.msra.mxu1 %v396_v9 }
  0x47   : > { %567 = vmatprep.mubr.f32.mxu1 %v357_v10  ;;  %493 = vmatmul.mubr.f32.vlgmr.msra.gmra.mxu0 %v354_v11 }
  0x48   : > { %568 = vmatmul.mubr.f32.vlgmr.msra.gmra.mxu1 %v356_v12  ;;  %497 = vmatprep.mubr.f32.mxu0 %v359_v13 }
  0x49   : > { %572 = vmatprep.mubr.f32.mxu1 %v361_v14 }
  0x4b   : > { %498 = vmatmul.mubr.f32.gmra.mxu0 %v358_v15 }
  0x4c   : > { %573 = vmatmul.mubr.f32.gmra.mxu1 %v360_v16 }
 0x107   : > { %v785_v17 = vpop.f32.mrf.mxu0 }
 0x108   : > { %v823_v18 = vpop.f32.mrf.mxu1 }
 0x109   : > { %v786_v19 = vpop.f32.mrf.mxu0 }
 0x10a   : > { %v824_v20 = vpop.f32.mrf.mxu1  ;;  %v787_v21 = vadd.f32 %v786_v19, %v785_v17 }
 0x10b   : > { %v825_v22 = vadd.f32 %v824_v20, %v823_v18  ;;  %v788_v24 = vpop.f32.mrf.mxu0 }
 0x10c   : > { %v826_v25 = vpop.f32.mrf.mxu1 }
 0x10d   : > { %v570_v26 = vadd.f32 %v825_v22, %v787_v21  ;;  %v789_v27 = vpop.f32.mrf.mxu0 }
 0x10e   : > { %v827_v28 = vpop.f32.mrf.mxu1  ;;  %v790_v30 = vadd.f32 %v789_v27, %v788_v24 }
 0x10f   : > { %v578_v29 = vadd.f32 %v570_v26, %v362_v23  ;;  %v828_v31 = vadd.f32 %v827_v28, %v826_v25 }
 0x111   : > { %581 = vst.msk [vmem:[#allocation2] sm:$0xff] %vm580_vm1, %v578_v29  ;;  %v575_v33 = vadd.f32 %v828_v31, %v790_v30  ;;  %586 = sbr.rel (%p746_p11) target bundleno = 290 (0x122), region = 67 }
 0x113   : > { %v579_v34 = vadd.f32 %v575_v33, %v363_v32 }
 0x115   : > { %582 = vst.msk [vmem:[#allocation2 + $0x8] sm:$0xff] %vm580_vm1, %v579_v34 }
 0x116   : > { %v747_v36 = vld [vmem:[%s1100_s2] ss:$0 sm:$0xff]  ;;  %v599_v40 = vld [vmem:[%s1101_s3 + $0x8] sm:$0xff] }
 0x117   : > { %v598_v37 = vld [vmem:[%s1101_s3] sm:$0xff] }
 0x118   : > { %v587_v35 = vld [vmem:[#allocation2] sm:$0xff] }
 0x119   : > { %v596_v38 = vadd.f32 %v747_v36, %v587_v35 }
 0x11b   : > { %v600_v42 = vadd.f32 %v598_v37, %v596_v38 }
 0x11c   : > { %v588_v39 = vld [vmem:[#allocation2 + $0x8] sm:$0xff] }
 0x11d   : > { %v597_v41 = vadd.f32 %v747_v36, %v588_v39  ;;  %602 = vst.msk [vmem:[%s1102_s4] sm:$0xff] %vm580_vm1, %v600_v42 }
 0x11f   : > { %v601_v43 = vadd.f32 %v599_v40, %v597_v41 }
 0x121   : > { %603 = vst.msk [vmem:[%s1102_s4 + $0x8] sm:$0xff] %vm580_vm1, %v601_v43 }
 0x122 PF: > { %s14_s19 = sadd.s32 1, %s908_s19   ;;  %s1103_s15 = smov %s896_s16 }
 0x123   : > { %p11_p12 = scmp.ge.s32.totalorder %s14_s19, 6   ;;  %s1104_s16 = smov %s971_s23 }
 0x124   : > { %s1105_s17 = smov %s904_s18  ;;  %s1106_s18 = smov %s1108_s20 }
 0x125   :  { %13 = sbr.rel (!%p11_p12) target bundleno = 3 (0x3), region = 111 }

// kernel: compressive_transformer_forward.21
= control target key start
LH: loop header
LB: loop body
LE: loop exit
PB: predicated region body
PF: predicated region fallthrough
CT: control target
= control target key end

     0   :  { %vm17_vm0 = vcmask 261120   ;;  %s156_s0 = inlined_call_operand.vmem [shape: f32[16,32], index: 0, kind: input, shape index: {}]   ;;  %s157_s1 = inlined_call_operand.vmem [shape: f32[1,32], index: 1, kind: input, shape index: {}]   ;;  %s158_s2 = inlined_call_operand.vmem [shape: f32[1,32], index: 2, kind: input, shape index: {}]   ;;  %s159_s3 = inlined_call_operand.hbm [shape: f32[16,32], index: 3, kind: output, shape index: {}]  }
   0x1   :  { %v15_v0 = vld [vmem:[%s156_s0] sm:$0xff]  ;;  %v16_v1 = vld [vmem:[%s156_s0 + $0x8] sm:$0xff] }
   0x2   :  { %8 = vsyncpa [#allocation3], 0  ;;  %v18_v2 = vsel %vm17_vm0, %v15_v0, 0.0  ;;  %v21_v3 = vsel %vm17_vm0, %v16_v1, 0.0  ;;  %v81_v21 = vld [vmem:[%s157_s1] ss:$0 sm:$0xff] }
   0x3   :  { %19 = vadd.xlane.f32.xlu0 %v18_v2  ;;  %v82_v23 = vld [vmem:[%s158_s2] ss:$0 sm:$0xff]  ;;  %s112_s19 = smov [#allocation2]  }
   0x4   :  { %s70_s20 = sshll.u32 %s112_s19, 4  ;;  %s71_s20 = int_to_ptr.vmem [resolvable:$true] %s70_s20 }
   0x5   :  { %s90_s21 = scalar_lea.vmem %s71_s20, 256  ;;  %p95_p1 = scmp.lt.s32.totalorder %s71_s20, %s71_s20 }
   0x6   :  { %p91_p0 = scmp.ne.s32.totalorder %s71_s20, %s90_s21  ;;  %p96_p2 = scmp.lt.s32.totalorder %s90_s21, %s90_s21 }
   0x7   :  { %22 = vadd.xlane.f32.xlu0 %v21_v3 }
   0x8   :  { %p97_p3 = por %p96_p2, %p95_p1 }
   0xa   :  { %p98_p4 = pnand %p97_p3, %p91_p0 }
  0x8c   :  { %v20_v4 = vpop.xlane.xlu0 %19 }
  0x8d   :  { %v25_v5 = vmul.f32 0.03125, %v20_v4 }
  0x8f   :  { %v27_v6 = vsub.f32 %v15_v0, %v25_v5 }
  0x90   :  { %v23_v7 = vpop.xlane.xlu0 %22 }
  0x91   :  { %v26_v8 = vmul.f32 0.03125, %v23_v7  ;;  %v29_v9 = vmul.f32 %v27_v6, %v27_v6 }
  0x93   :  { %v28_v10 = vsub.f32 %v16_v1, %v26_v8  ;;  %v31_v11 = vsel %vm17_vm0, %v29_v9, 0.0 }
  0x94   :  { %32 = vadd.xlane.f32.xlu1 %v31_v11 }
  0x95   :  { %v30_v12 = vmul.f32 %v28_v10, %v28_v10 }
  0x97   :  { %v34_v13 = vsel %vm17_vm0, %v30_v12, 0.0 }
  0x98   :  { %35 = vadd.xlane.f32.xlu1 %v34_v13 }
 0x11d   :  { %v33_v14 = vpop.xlane.xlu1 %32 }
 0x11e   :  { %v37_v15 = vmul.f32 0.03125, %v33_v14 }
 0x120   :  { %v39_v16 = vadd.f32 1e-05, %v37_v15 }
 0x121   :  { %v36_v17 = vpop.xlane.xlu1 %35 }
 0x122   :  { %86 = vrsqrt.f32 %v39_v16  ;;  %v38_v18 = vmul.f32 0.03125, %v36_v17 }
 0x124   :  { %v40_v19 = vadd.f32 1e-05, %v38_v18 }
 0x126   :  { %88 = vrsqrt.f32 %v40_v19 }
 0x12f   :  { %v87_v20 = vpop.eup %86 }
 0x130   :  { %v43_v22 = vmul.f32 %v87_v20, %v27_v6 }
 0x132   :  { %v52_v24 = vmul.f32 %v81_v21, %v43_v22 }
 0x133   :  { %v89_v25 = vpop.eup %88 }
 0x134   :  { %v44_v26 = vmul.f32 %v89_v25, %v28_v10  ;;  %v61_v27 = vadd.f32 %v82_v23, %v52_v24 }
 0x136   :  { %v53_v28 = vmul.f32 %v81_v21, %v44_v26  ;;  %63 = vst.msk [vmem:[#allocation2] sm:$0xff] %vm17_vm0, %v61_v27 }
 0x138   :  { %v62_v29 = vadd.f32 %v82_v23, %v53_v28 }
 0x13a   :  { %64 = vst.msk [vmem:[#allocation2 + $0x8] sm:$0xff] %vm17_vm0, %v62_v29 }
 0x13b   :  { %101 = shalt.err (!%p98_p4)
}
 0x13c   :  { %s113_s1 = smov 128   ;;  %s114_s2 = smov 8  }
 0x13d   :  { %76 = dma.vmem_to_hbm [thread:$0]  %s71_s20, 256, %s159_s3, [#allocation3], %s113_s1, %s113_s1, %s114_s2  }
 0x13e   :  { %110 = dma.done.wait [#allocation3], 256  }
 0x13f   :  { %111 = vsyncadd [#allocation3], 4294967040 }
 0x140   :  { %80 = vsyncpa [#allocation3], 1 }

</bundles_post_ra>
